<compile_context>
chip_gen: v5e
topology: v5e:2x2
jax: 0.10.0
libtpu: 0.0.40
codegen_flags: <defaults>
</compile_context>

<pallas_src>
import numpy as np
import jax
import jax.numpy as jnp
from jax.experimental import pallas as pl
from jax.experimental.pallas import tpu as pltpu

K = 7            # pooling kernel size
PAD = K // 2     # reflection pad (3)
C1 = 0.01 ** 2
C2 = 0.03 ** 2


def _reflect_box_matrix(n: int) -> np.ndarray:
    """(n, n) matrix M with M[i, r] = #{d in [-PAD, PAD] : reflect(i + d) == r}.

    Folds ReflectionPad(PAD) followed by a K-tap box sum along one axis into a
    single matmul: rows -> M @ plane, columns -> plane @ M.T.
    """
    assert n > PAD, "reflection pad of 3 needs spatial dims >= 4"
    m = np.zeros((n, n), dtype=np.float32)
    for i in range(n):
        for d in range(-PAD, PAD + 1):
            q = i + d
            if q < 0:
                q = -q
            elif q >= n:
                q = 2 * (n - 1) - q
            m[i, q] += 1.0
    return m


def _ssim_kernel(mv_ref, mhb_ref, x_ref, y_ref, o_ref):
    # mv_ref  : (H, H)    combined reflect-pad + box matrix (row axis)
    # mhb_ref : (LW, LW)  block-diagonal reflect-pad + box matrix (lane axis)
    # x_ref   : (H, LW)   lane-dense planes (LW = Cb * W, plane-major lanes)
    # y_ref   : (H, LW)
    # o_ref   : (H, LW)   SSIM map
    mv = mv_ref[...]
    mhb = mhb_ref[...]
    xv = x_ref[...].astype(jnp.float32)
    yv = y_ref[...].astype(jnp.float32)

    def box(f):
        # Separable 7x7 box sum of the reflection-padded plane, on the MXU.
        t = jnp.dot(mv, f, preferred_element_type=jnp.float32,
                    precision=jax.lax.Precision.HIGHEST)
        return jnp.dot(t, mhb, preferred_element_type=jnp.float32,
                       precision=jax.lax.Precision.HIGHEST)

    inv = jnp.float32(1.0 / (K * K))
    mu_x = box(xv) * inv
    mu_y = box(yv) * inv
    sigma_x = box(xv * xv) * inv - mu_x * mu_x
    sigma_y = box(yv * yv) * inv - mu_y * mu_y
    sigma_xy = box(xv * yv) * inv - mu_x * mu_y

    ssim_n = (2.0 * mu_x * mu_y + C1) * (2.0 * sigma_xy + C2)
    ssim_d = (mu_x * mu_x + mu_y * mu_y + C1) * (sigma_x + sigma_y + C2)
    o_ref[...] = jnp.clip(ssim_n / ssim_d, 0.0, 1.0).astype(o_ref.dtype)


def _vmem_budget_bytes() -> int:
    # Chip-aware budget when queryable (<= ~40% of per-core VMEM: 64 MiB on
    # v7x, 128 MiB on v5e/v6e); conservative fallback otherwise.
    try:
        cap = int(pltpu.get_tpu_info().vmem_capacity_bytes)
        return max(8 << 20, int(cap * 0.4))
    except Exception:
        return 24 << 20


def _choose_block(P: int, W: int, H: int, in_itemsize: int):
    """Largest divisor Cb of P whose lane block (Cb*W) is 128-aligned (or the
    full width) and fits the VMEM budget. Fewest grid steps = least per-step
    overhead on single-TC chips; blocks stay independent for v7x megacore."""
    budget = _vmem_budget_bytes()

    def need(cb):
        lw = cb * W
        # double-buffered x/y/out blocks + ~8 live f32 plane-sized temporaries
        # + the two constant matrices (also double-buffered by the pipeline).
        return ((2 * 2 + 2) * H * lw * max(in_itemsize, 4)
                + 8 * H * lw * 4
                + 2 * (H * H + lw * lw) * 4)

    divs = sorted((d for d in range(1, P + 1) if P % d == 0), reverse=True)
    valid = [d for d in divs if d == P or (d * W) % 128 == 0]
    for d in valid:
        if d * W <= 4096 and need(d) <= budget:
            return d, need(d)
    # TODO(synk): fall back to H-tiling with a 6-row halo for huge planes.
    d = valid[-1]
    return d, need(d)


def ssim(x, y):
    """Pallas SSIM. x, y: (N, C, H, W). Returns the per-pixel SSIM map."""
    assert x.shape == y.shape and x.ndim == 4
    N, C, H, W = x.shape
    assert H > PAD and W > PAD, "SSIM with k=7 needs spatial dims >= 4"
    P = N * C

    Cb, vmem_need = _choose_block(P, W, H, x.dtype.itemsize)
    G = P // Cb
    LW = Cb * W

    mv = jnp.asarray(_reflect_box_matrix(H))                        # (H, H)
    mh = _reflect_box_matrix(W).T                                   # (W, W) [c, j]
    mhb = jnp.asarray(np.kron(np.eye(Cb, dtype=np.float32), mh))    # (LW, LW)

    # Lane-dense layout: (N, C, H, W) -> (H, P*W); each plane owns W lanes.
    x2 = jnp.transpose(x.reshape(P, H, W), (1, 0, 2)).reshape(H, P * W)
    y2 = jnp.transpose(y.reshape(P, H, W), (1, 0, 2)).reshape(H, P * W)

    vmem_limit = None
    if vmem_need > (12 << 20):
        vmem_limit = int(vmem_need * 1.5) + (2 << 20)

    cost = pl.CostEstimate(
        flops=int(G * 5 * 2 * (H * H * LW + H * LW * LW) + 40 * P * H * W),
        transcendentals=0,
        bytes_accessed=int(3 * P * H * W * x.dtype.itemsize
                           + 4 * (H * H + LW * LW)),
    )

    out2 = pl.pallas_call(
        _ssim_kernel,
        out_shape=jax.ShapeDtypeStruct((H, P * W), x.dtype),
        grid_spec=pltpu.PrefetchScalarGridSpec(
            num_scalar_prefetch=0,
            grid=(G,),
            in_specs=[
                pl.BlockSpec((H, H), lambda b: (0, 0)),       # Mv (resident)
                pl.BlockSpec((LW, LW), lambda b: (0, 0)),     # blockdiag(Mh)
                pl.BlockSpec((H, LW), lambda b: (0, b)),      # x planes
                pl.BlockSpec((H, LW), lambda b: (0, b)),      # y planes
            ],
            out_specs=pl.BlockSpec((H, LW), lambda b: (0, b)),
        ),
        compiler_params=pltpu.CompilerParams(
            dimension_semantics=("parallel",),
            vmem_limit_bytes=vmem_limit,
        ),
        cost_estimate=cost,
    )(mv, mhb, x2, y2)

    return jnp.transpose(out2.reshape(H, P, W), (1, 0, 2)).reshape(N, C, H, W)


def _ssim_ref(x, y):
    """Pure-JAX reference (reflect pad + reduce_window avg pool)."""
    pad_cfg = ((0, 0), (0, 0), (PAD, PAD), (PAD, PAD))
    xp = jnp.pad(x, pad_cfg, mode="reflect")
    yp = jnp.pad(y, pad_cfg, mode="reflect")

    def avg_pool(z):
        s = jax.lax.reduce_window(
            z, 0.0, jax.lax.add, (1, 1, K, K), (1, 1, 1, 1), "VALID")
        return s / (K * K)

    mu_x = avg_pool(xp)
    mu_y = avg_pool(yp)
    sigma_x = avg_pool(xp * xp) - mu_x * mu_x
    sigma_y = avg_pool(yp * yp) - mu_y * mu_y
    sigma_xy = avg_pool(xp * yp) - mu_x * mu_y
    n = (2 * mu_x * mu_y + C1) * (2 * sigma_xy + C2)
    d = (mu_x * mu_x + mu_y * mu_y + C1) * (sigma_x + sigma_y + C2)
    return jnp.clip(n / d, 0.0, 1.0)


if __name__ == "__main__":
    key = jax.random.PRNGKey(0)
    kx, ky = jax.random.split(key)
    N, C, H, W = 2, 4, 16, 16
    x = jax.random.uniform(kx, (N, C, H, W), dtype=jnp.float32)
    y = jax.random.uniform(ky, (N, C, H, W), dtype=jnp.float32)

    out = jax.block_until_ready(ssim(x, y))

    ref = _ssim_ref(x, y)
    assert out.shape == (N, C, H, W)
    err = float(jnp.max(jnp.abs(out - ref)))
    assert err < 2e-4, f"max abs diff vs reference: {err}"

    print("KERNEL_OK")
</pallas_src>

<mosaic_0001>
module attributes {stable_mosaic.version = 11 : i64} {
  func.func @_ssim_kernel(%arg0: i32, %arg1: memref<16x16xf32, #tpu.memory_space<vmem>>, %arg2: memref<128x128xf32, #tpu.memory_space<vmem>>, %arg3: memref<16x128xf32, #tpu.memory_space<vmem>>, %arg4: memref<16x128xf32, #tpu.memory_space<vmem>>, %arg5: memref<16x128xf32, #tpu.memory_space<vmem>>) attributes {dimension_semantics = [#tpu.dimension_semantics<parallel>], iteration_bounds = array<i64: 1>, scalar_prefetch = 0 : i64, scratch_operands = 0 : i64, tpu.core_type = #tpu.core_type<tc>, window_params = [{pipeline_mode = #tpu.pipeline_mode<synchronous>, transform_indices = @transform_0, window_bounds = array<i64: 16, 16>}, {pipeline_mode = #tpu.pipeline_mode<synchronous>, transform_indices = @transform_1, window_bounds = array<i64: 128, 128>}, {transform_indices = @transform_2, window_bounds = array<i64: 16, 128>}, {transform_indices = @transform_3, window_bounds = array<i64: 16, 128>}, {transform_indices = @transform_4, window_bounds = array<i64: 16, 128>}]} {
    %c0 = arith.constant 0 : index
    %c0_0 = arith.constant 0 : index
    %0 = vector.load %arg1[%c0, %c0_0] : memref<16x16xf32, #tpu.memory_space<vmem>>, vector<16x16xf32>
    %c0_1 = arith.constant 0 : index
    %c0_2 = arith.constant 0 : index
    %1 = vector.load %arg2[%c0_1, %c0_2] : memref<128x128xf32, #tpu.memory_space<vmem>>, vector<128x128xf32>
    %c0_3 = arith.constant 0 : index
    %c0_4 = arith.constant 0 : index
    %2 = vector.load %arg3[%c0_3, %c0_4] : memref<16x128xf32, #tpu.memory_space<vmem>>, vector<16x128xf32>
    %c0_5 = arith.constant 0 : index
    %c0_6 = arith.constant 0 : index
    %3 = vector.load %arg4[%c0_5, %c0_6] : memref<16x128xf32, #tpu.memory_space<vmem>>, vector<16x128xf32>
    %cst = arith.constant dense<0.000000e+00> : vector<16x128xf32>
    %4 = tpu.matmul %0, %2, %cst {dimension_numbers = #tpu.dot_dimension_numbers<[1], [0], [0], [1], [0, 0, 1, 1], [], []>, precision = #tpu.contract_precision<fp32>} : vector<16x16xf32>, vector<16x128xf32>, vector<16x128xf32> -> vector<16x128xf32>
    %cst_7 = arith.constant dense<0.000000e+00> : vector<16x128xf32>
    %5 = tpu.matmul %4, %1, %cst_7 {dimension_numbers = #tpu.dot_dimension_numbers<[1], [0], [0], [1], [0, 0, 1, 1], [], []>, precision = #tpu.contract_precision<fp32>} : vector<16x128xf32>, vector<128x128xf32>, vector<16x128xf32> -> vector<16x128xf32>
    %cst_8 = arith.constant 0.0204081628 : f32
    %6 = vector.broadcast %cst_8 : f32 to vector<16x128xf32>
    %7 = arith.mulf %5, %6 : vector<16x128xf32>
    %cst_9 = arith.constant dense<0.000000e+00> : vector<16x128xf32>
    %8 = tpu.matmul %0, %3, %cst_9 {dimension_numbers = #tpu.dot_dimension_numbers<[1], [0], [0], [1], [0, 0, 1, 1], [], []>, precision = #tpu.contract_precision<fp32>} : vector<16x16xf32>, vector<16x128xf32>, vector<16x128xf32> -> vector<16x128xf32>
    %cst_10 = arith.constant dense<0.000000e+00> : vector<16x128xf32>
    %9 = tpu.matmul %8, %1, %cst_10 {dimension_numbers = #tpu.dot_dimension_numbers<[1], [0], [0], [1], [0, 0, 1, 1], [], []>, precision = #tpu.contract_precision<fp32>} : vector<16x128xf32>, vector<128x128xf32>, vector<16x128xf32> -> vector<16x128xf32>
    %cst_11 = arith.constant 0.0204081628 : f32
    %10 = vector.broadcast %cst_11 : f32 to vector<16x128xf32>
    %11 = arith.mulf %9, %10 : vector<16x128xf32>
    %12 = arith.mulf %2, %2 : vector<16x128xf32>
    %cst_12 = arith.constant dense<0.000000e+00> : vector<16x128xf32>
    %13 = tpu.matmul %0, %12, %cst_12 {dimension_numbers = #tpu.dot_dimension_numbers<[1], [0], [0], [1], [0, 0, 1, 1], [], []>, precision = #tpu.contract_precision<fp32>} : vector<16x16xf32>, vector<16x128xf32>, vector<16x128xf32> -> vector<16x128xf32>
    %cst_13 = arith.constant dense<0.000000e+00> : vector<16x128xf32>
    %14 = tpu.matmul %13, %1, %cst_13 {dimension_numbers = #tpu.dot_dimension_numbers<[1], [0], [0], [1], [0, 0, 1, 1], [], []>, precision = #tpu.contract_precision<fp32>} : vector<16x128xf32>, vector<128x128xf32>, vector<16x128xf32> -> vector<16x128xf32>
    %cst_14 = arith.constant 0.0204081628 : f32
    %15 = vector.broadcast %cst_14 : f32 to vector<16x128xf32>
    %16 = arith.mulf %14, %15 : vector<16x128xf32>
    %17 = arith.mulf %7, %7 : vector<16x128xf32>
    %18 = arith.subf %16, %17 : vector<16x128xf32>
    %19 = arith.mulf %3, %3 : vector<16x128xf32>
    %cst_15 = arith.constant dense<0.000000e+00> : vector<16x128xf32>
    %20 = tpu.matmul %0, %19, %cst_15 {dimension_numbers = #tpu.dot_dimension_numbers<[1], [0], [0], [1], [0, 0, 1, 1], [], []>, precision = #tpu.contract_precision<fp32>} : vector<16x16xf32>, vector<16x128xf32>, vector<16x128xf32> -> vector<16x128xf32>
    %cst_16 = arith.constant dense<0.000000e+00> : vector<16x128xf32>
    %21 = tpu.matmul %20, %1, %cst_16 {dimension_numbers = #tpu.dot_dimension_numbers<[1], [0], [0], [1], [0, 0, 1, 1], [], []>, precision = #tpu.contract_precision<fp32>} : vector<16x128xf32>, vector<128x128xf32>, vector<16x128xf32> -> vector<16x128xf32>
    %cst_17 = arith.constant 0.0204081628 : f32
    %22 = vector.broadcast %cst_17 : f32 to vector<16x128xf32>
    %23 = arith.mulf %21, %22 : vector<16x128xf32>
    %24 = arith.mulf %11, %11 : vector<16x128xf32>
    %25 = arith.subf %23, %24 : vector<16x128xf32>
    %26 = arith.mulf %2, %3 : vector<16x128xf32>
    %cst_18 = arith.constant dense<0.000000e+00> : vector<16x128xf32>
    %27 = tpu.matmul %0, %26, %cst_18 {dimension_numbers = #tpu.dot_dimension_numbers<[1], [0], [0], [1], [0, 0, 1, 1], [], []>, precision = #tpu.contract_precision<fp32>} : vector<16x16xf32>, vector<16x128xf32>, vector<16x128xf32> -> vector<16x128xf32>
    %cst_19 = arith.constant dense<0.000000e+00> : vector<16x128xf32>
    %28 = tpu.matmul %27, %1, %cst_19 {dimension_numbers = #tpu.dot_dimension_numbers<[1], [0], [0], [1], [0, 0, 1, 1], [], []>, precision = #tpu.contract_precision<fp32>} : vector<16x128xf32>, vector<128x128xf32>, vector<16x128xf32> -> vector<16x128xf32>
    %cst_20 = arith.constant 0.0204081628 : f32
    %29 = vector.broadcast %cst_20 : f32 to vector<16x128xf32>
    %30 = arith.mulf %28, %29 : vector<16x128xf32>
    %31 = arith.mulf %7, %11 : vector<16x128xf32>
    %32 = arith.subf %30, %31 : vector<16x128xf32>
    %cst_21 = arith.constant 2.000000e+00 : f32
    %33 = vector.broadcast %cst_21 : f32 to vector<16x128xf32>
    %34 = arith.mulf %33, %7 : vector<16x128xf32>
    %35 = arith.mulf %34, %11 : vector<16x128xf32>
    %cst_22 = arith.constant 9.99999974E-5 : f32
    %36 = vector.broadcast %cst_22 : f32 to vector<16x128xf32>
    %37 = arith.addf %35, %36 : vector<16x128xf32>
    %cst_23 = arith.constant 2.000000e+00 : f32
    %38 = vector.broadcast %cst_23 : f32 to vector<16x128xf32>
    %39 = arith.mulf %38, %32 : vector<16x128xf32>
    %cst_24 = arith.constant 8.99999984E-4 : f32
    %40 = vector.broadcast %cst_24 : f32 to vector<16x128xf32>
    %41 = arith.addf %39, %40 : vector<16x128xf32>
    %42 = arith.mulf %37, %41 : vector<16x128xf32>
    %43 = arith.mulf %7, %7 : vector<16x128xf32>
    %44 = arith.mulf %11, %11 : vector<16x128xf32>
    %45 = arith.addf %43, %44 : vector<16x128xf32>
    %cst_25 = arith.constant 9.99999974E-5 : f32
    %46 = vector.broadcast %cst_25 : f32 to vector<16x128xf32>
    %47 = arith.addf %45, %46 : vector<16x128xf32>
    %48 = arith.addf %18, %25 : vector<16x128xf32>
    %cst_26 = arith.constant 8.99999984E-4 : f32
    %49 = vector.broadcast %cst_26 : f32 to vector<16x128xf32>
    %50 = arith.addf %48, %49 : vector<16x128xf32>
    %51 = arith.mulf %47, %50 : vector<16x128xf32>
    %52 = arith.divf %42, %51 : vector<16x128xf32>
    %cst_27 = arith.constant 0.000000e+00 : f32
    %cst_28 = arith.constant 1.000000e+00 : f32
    %53 = vector.broadcast %cst_27 : f32 to vector<16x128xf32>
    %54 = arith.maximumf %53, %52 : vector<16x128xf32>
    %55 = vector.broadcast %cst_28 : f32 to vector<16x128xf32>
    %56 = arith.minimumf %55, %54 : vector<16x128xf32>
    %c0_29 = arith.constant 0 : index
    %c0_30 = arith.constant 0 : index
    %57 = vector.load %arg5[%c0_29, %c0_30] : memref<16x128xf32, #tpu.memory_space<vmem>>, vector<16x128xf32>
    tpu.vector_store %arg5[%c0_29, %c0_30], %56 {strides = array<i32>} : memref<16x128xf32, #tpu.memory_space<vmem>>, vector<16x128xf32>,
    return
  }
  func.func @transform_0(%arg0: i32) -> (i32, i32) {
    %c0_i32 = arith.constant 0 : i32
    %c0_i32_0 = arith.constant 0 : i32
    %c0_i32_1 = arith.constant 0 : i32
    return %c0_i32, %c0_i32_0 : i32, i32
  }
  func.func @transform_1(%arg0: i32) -> (i32, i32) {
    %c0_i32 = arith.constant 0 : i32
    %c0_i32_0 = arith.constant 0 : i32
    %c0_i32_1 = arith.constant 0 : i32
    return %c0_i32, %c0_i32_0 : i32, i32
  }
  func.func @transform_2(%arg0: i32) -> (i32, i32) {
    %c0_i32 = arith.constant 0 : i32
    %c0_i32_0 = arith.constant 0 : i32
    return %c0_i32, %arg0 : i32, i32
  }
  func.func @transform_3(%arg0: i32) -> (i32, i32) {
    %c0_i32 = arith.constant 0 : i32
    %c0_i32_0 = arith.constant 0 : i32
    return %c0_i32, %arg0 : i32, i32
  }
  func.func @transform_4(%arg0: i32) -> (i32, i32) {
    %c0_i32 = arith.constant 0 : i32
    %c0_i32_0 = arith.constant 0 : i32
    return %c0_i32, %arg0 : i32, i32
  }
}

</mosaic_0001>

<bundles_post_ra>
// kernel: tpu_custom_call.1
= control target key start
LH: loop header
LB: loop body
LE: loop exit
PB: predicated region body
PF: predicated region fallthrough
CT: control target
= control target key end

     0   :  { %9 = vsyncpa [#allocation3], 0  ;;  %s4136_s0 = inlined_call_operand.hbm [shape: f32[16,16], index: 0, kind: input, shape index: {}]   ;;  %s4137_s1 = inlined_call_operand.hbm [shape: f32[128,128], index: 1, kind: input, shape index: {}]   ;;  %s4138_s2 = inlined_call_operand.hbm [shape: f32[16,128], index: 2, kind: input, shape index: {}]   ;;  %s4139_s3 = inlined_call_operand.hbm [shape: f32[16,128], index: 3, kind: input, shape index: {}]   ;;  %s4140_s4 = inlined_call_operand.hbm [shape: f32[16,128], index: 4, kind: output, shape index: {}]  }
   0x1   :  { %10 = vsyncpa [#allocation6], 0 }
   0x2   :  { %11 = vsyncpa [#allocation9], 0 }
   0x3   :  { %12 = vsyncpa [#allocation4], 0  ;;  %s30_s17 = sshll.u32 %s4137_s1, 4  ;;  %s3174_s18 = smov [#allocation5]   ;;  %s31_s17 = int_to_ptr.hbm [resolvable:$true] %s30_s17 }
   0x4   :  { %s32_s19 = sshll.u32 %s3174_s18, 4  ;;  %s17_s22 = sshll.u32 %s4136_s0, 4  ;;  %s33_s19 = int_to_ptr.vmem [resolvable:$true] %s32_s19  ;;  %s18_s22 = int_to_ptr.hbm [resolvable:$true] %s17_s22 }
   0x5   :  { %s3175_s23 = smov 128   ;;  %s3176_s24 = smov 8  }
   0x6   :  { %38 = dma.hbm_to_vmem [thread:$0]  %s31_s17, 2048, %s33_s19, [#allocation6], %s3175_s23, %s3175_s23, %s3176_s24  }
   0x7   :  { %s3177_s25 = smov [#allocation2]   ;;  %s43_s1 = sshll.u32 %s4138_s2, 4  ;;  %s44_s1 = int_to_ptr.hbm [resolvable:$true] %s43_s1 }
   0x8   :  { %s19_s26 = sshll.u32 %s3177_s25, 4  ;;  %s56_s30 = sshll.u32 %s4139_s3, 4  ;;  %s20_s26 = int_to_ptr.vmem [resolvable:$true] %s19_s26  ;;  %s57_s30 = int_to_ptr.hbm [resolvable:$true] %s56_s30 }
   0x9   :  { %25 = dma.hbm_to_vmem [thread:$0]  %s18_s22, 256, %s20_s26, [#allocation3], %s3175_s23, %s3175_s23, %s3176_s24  }
   0xa   :  { %s3178_s5 = smov [#allocation7]   ;;  %s3179_s7 = smov [#allocation8]  }
   0xb   :  { %s45_s6 = sshll.u32 %s3178_s5, 4  ;;  %s58_s2 = sshll.u32 %s3179_s7, 4  ;;  %s46_s6 = int_to_ptr.vmem [resolvable:$true] %s45_s6  ;;  %s59_s2 = int_to_ptr.vmem [resolvable:$true] %s58_s2 }
   0xc   :  { %51 = dma.hbm_to_vmem [thread:$0]  %s44_s1, 256, %s46_s6, [#allocation6], %s3175_s23, %s3175_s23, %s3176_s24  }
   0xd   :  { %64 = dma.hbm_to_vmem [thread:$0]  %s57_s30, 256, %s59_s2, [#allocation9], %s3175_s23, %s3175_s23, %s3176_s24  }
   0xe   :  { %3166 = dma.done.wait [#allocation3], 256  }
   0xf   :  { %3167 = vsyncadd [#allocation3], 4294967040 }
  0x10   :  { %3168 = dma.done.wait [#allocation6], 2304  }
  0x11   :  { %3169 = vsyncadd [#allocation6], 4294964992 }
  0x12   :  { %3170 = dma.done.wait [#allocation9], 256  }
  0x13   :  { %3171 = vsyncadd [#allocation9], 4294967040  ;;  %vm103_vm0 = vcmask 130048   ;;  %v3230_v0 = vld [vmem:[#allocation7 + $0x8] sm:$0xff]  ;;  %v3232_v1 = vld [vmem:[#allocation7] sm:$0xff]  ;;  %s3180_s3 = smov [#allocation10]  }
  0x14   :  { %4255 = vst [vmem:[#allocation15_spill] sm:$0xff] %v3230_v0  ;;  %v81_v2 = vld [vmem:[#allocation2] sm:$0xff]  ;;  %v3235_v3 = vand.u32 4294901760, %v3230_v0  ;;  %v3238_v4 = vand.u32 4294901760, %v3232_v1  ;;  %v82_v5 = vld [vmem:[#allocation2 + $0x8] sm:$0xff]  ;;  %v96_v18 = vld [vmem:[#allocation5 + $0x68] sm:$0xff] }
  0x15   :  { %4256 = vst [vmem:[#allocation16_spill] sm:$0xff] %v3232_v1  ;;  %v105_v6 = vsel %vm103_vm0, %v81_v2, 0  ;;  %v108_v7 = vsel %vm103_vm0, %v82_v5, 0  ;;  %v98_v16 = vld [vmem:[#allocation5 + $0x78] sm:$0xff]  ;;  %v97_v17 = vld [vmem:[#allocation5 + $0x70] sm:$0xff]  ;;  %v95_v23 = vld [vmem:[#allocation5 + $0x60] sm:$0xff] }
  0x16   :  { %v160_v8 = vsub.f32 %v3230_v0, %v3235_v3  ;;  %125 = vmatpush.msra.mxu0 %v3235_v3  ;;  %v166_v9 = vsub.f32 %v3232_v1, %v3238_v4  ;;  %226 = vmatpush.msra.mxu3 %v3235_v3  ;;  %v3246_v10 = vand.u32 4294901760, %v105_v6  ;;  %v3248_v11 = vand.u32 4294901760, %v108_v7  ;;  %v94_v28 = vld [vmem:[#allocation5 + $0x58] sm:$0xff]  ;;  %v93_v29 = vld [vmem:[#allocation5 + $0x50] sm:$0xff]  ;;  %v92_v37 = vld [vmem:[#allocation5 + $0x48] sm:$0xff]  ;;  %s3010_s8 = sshll.u32 %s3180_s3, 4  ;;  %s3011_s8 = int_to_ptr.vmem [resolvable:$true] %s3010_s8 }
  0x17   :  { %v3265_v24 = vand.u32 4294901760, %v98_v16  ;;  %v3267_v25 = vand.u32 4294901760, %v97_v17  ;;  %v3269_v26 = vand.u32 4294901760, %v96_v18  ;;  %v3271_v27 = vand.u32 4294901760, %v95_v23  ;;  %v91_v38 = vld [vmem:[#allocation5 + $0x40] sm:$0xff]  ;;  %v90_v58 = vld [vmem:[#allocation5 + $0x38] sm:$0xff] }
  0x18   :  { %196 = vmatpush.msra.mxu2 %v160_v8  ;;  %v3251_v12 = vsub.f32 %v105_v6, %v3246_v10  ;;  %127 = vmatpush.msra.mxu0 %v3238_v4  ;;  %v161_v13 = vand.u32 4294901760, %v160_v8  ;;  %v167_v14 = vand.u32 4294901760, %v166_v9  ;;  %v3255_v15 = vsub.f32 %v108_v7, %v3248_v11  ;;  %v89_v59 = vld [vmem:[#allocation5 + $0x30] sm:$0xff]  ;;  %v88_v60 = vld [vmem:[#allocation5 + $0x28] sm:$0xff]  ;;  %v87_v6 = vld [vmem:[#allocation5 + $0x20] sm:$0xff]  ;;  %s3012_s11 = sshll.u32 %s4140_s4, 4  ;;  %s3013_s11 = int_to_ptr.hbm [resolvable:$true] %s3012_s11 }
  0x19   :  { %228 = vmatpush.msra.mxu3 %v3238_v4  ;;  %v3277_v33 = vsub.f32 %v98_v16, %v3265_v24  ;;  %v3280_v34 = vsub.f32 %v97_v17, %v3267_v25  ;;  %v3283_v35 = vsub.f32 %v96_v18, %v3269_v26  ;;  %v3286_v36 = vsub.f32 %v95_v23, %v3271_v27 }
  0x1a   :  { %4257 = vst [vmem:[#allocation17_spill] sm:$0xff] %v3255_v15  ;;  %199 = vmatpush.msra.mxu2 %v166_v9  ;;  %v162_v19 = vsub.f32 %v160_v8, %v161_v13  ;;  %v3259_v20 = vand.u32 4294901760, %v3251_v12  ;;  %259 = vmatpush.msrb.mxu0 %v161_v13  ;;  %v168_v21 = vsub.f32 %v166_v9, %v167_v14  ;;  %v3262_v22 = vand.u32 4294901760, %v3255_v15 }
  0x1b   :  { %202 = vmatmul.f32.vlgmr.msra.gmra.mxu2 %v3251_v12  ;;  %4259 = vst [vmem:[#allocation19_spill] sm:$0xff] %v3283_v35  ;;  %v3293_v41 = vand.u32 4294901760, %v94_v28  ;;  %v3295_v42 = vand.u32 4294901760, %v93_v29  ;;  %v3298_v43 = vand.u32 4294901760, %v3277_v33  ;;  %v3301_v44 = vand.u32 4294901760, %v3280_v34 }
  0x1c   :  { %4258 = vst [vmem:[#allocation18_spill] sm:$0xff] %v3262_v22  ;;  %v163_v30 = vand.u32 4294901760, %v162_v19  ;;  %v131_v31 = vsub.f32 %v3251_v12, %v3259_v20  ;;  %232 = vmatmul.f32.vlgmr.msra.gmra.mxu3 %v3259_v20  ;;  %v169_v32 = vand.u32 4294901760, %v168_v21  ;;  %263 = vmatpush.msrb.mxu0 %v167_v14  ;;  %v139_v40 = vsub.f32 %v3255_v15, %v3262_v22 }
  0x1d   :  { %4260 = vst [vmem:[#allocation20_spill] sm:$0xff] %v3286_v36  ;;  %301 = vmatpush.msrb.mxu2 %v3265_v24  ;;  %v3304_v45 = vand.u32 4294901760, %v3283_v35  ;;  %v3307_v46 = vand.u32 4294901760, %v3286_v36  ;;  %v3312_v47 = vsub.f32 %v94_v28, %v3293_v41  ;;  %v3315_v48 = vsub.f32 %v93_v29, %v3295_v42 }
  0x1e   :  { %164 = vmatpush.msra.mxu1 %v163_v30  ;;  %v3289_v39 = vand.u32 4294901760, %v131_v31  ;;  %4261 = vst [vmem:[#allocation21_spill] sm:$0xff] %v3298_v43  ;;  %v3317_v49 = vand.u32 4294901760, %v92_v37  ;;  %v3319_v50 = vand.u32 4294901760, %v91_v38  ;;  %v352_v51 = vsub.f32 %v3277_v33, %v3298_v43 }
  0x1f   :  { %4262 = vst [vmem:[#allocation22_spill] sm:$0xff] %v3301_v44  ;;  %303 = vmatpush.msrb.mxu2 %v3267_v25  ;;  %v358_v52 = vsub.f32 %v3280_v34, %v3301_v44  ;;  %v364_v53 = vsub.f32 %v3283_v35, %v3304_v45  ;;  %v370_v54 = vsub.f32 %v3286_v36, %v3307_v46  ;;  %v3332_v55 = vand.u32 4294901760, %v3312_v47 }
  0x20   :  { %4263 = vst [vmem:[#allocation23_spill] sm:$0xff] %v3304_v45  ;;  %133 = vmatmul.f32.vlgmr.msra.gmra.mxu0 %v3289_v39  ;;  %170 = vmatpush.msra.mxu1 %v169_v32  ;;  %v3335_v56 = vand.u32 4294901760, %v3315_v48  ;;  %v3339_v57 = vsub.f32 %v92_v37, %v3317_v49  ;;  %v3342_v61 = vand.u32 4294901760, %v352_v51  ;;  %v3347_v63 = vsub.f32 %v91_v38, %v3319_v50 }
  0x21   :  { %4264 = vst [vmem:[#allocation24_spill] sm:$0xff] %v3307_v46  ;;  %172 = vmatmul.f32.vlgmr.msra.gmra.mxu1 %v3246_v10  ;;  %305 = vmatpush.msrb.mxu2 %v3269_v26  ;;  %v3344_v62 = vand.u32 4294901760, %v358_v52  ;;  %v3350_v2 = vand.u32 4294901760, %v139_v40  ;;  %v376_v5 = vsub.f32 %v3312_v47, %v3332_v55  ;;  %v3363_v8 = vand.u32 4294901760, %v90_v58 }
  0x22   :  { %4265 = vst [vmem:[#allocation25_spill] sm:$0xff] %v3312_v47  ;;  %288 = vmatpush.msrb.mxu1 %v3235_v3  ;;  %456 = vmatpush.msra.mxu0 %v3277_v33  ;;  %v3354_v3 = vand.u32 4294901760, %v364_v53  ;;  %v3360_v7 = vand.u32 4294901760, %v3339_v57  ;;  %v3365_v9 = vand.u32 4294901760, %v89_v59  ;;  %v3367_v13 = vand.u32 4294901760, %v88_v60 }
  0x23   :  { %4266 = vst [vmem:[#allocation26_spill] sm:$0xff] %v3315_v48  ;;  %207 = vmatmul.f32.gmra.mxu2 %v3255_v15  ;;  %354 = vmatpush.msrb.mxu3 %v3342_v61  ;;  %v382_v14 = vsub.f32 %v3315_v48, %v3335_v56  ;;  %v3377_v16 = vand.u32 4294901760, %v3347_v63  ;;  %v3381_v17 = vsub.f32 %v90_v58, %v3363_v8  ;;  %v3386_v19 = vand.u32 4294901760, %v87_v6 }
  0x24   :  { %4267 = vst [vmem:[#allocation27_spill] sm:$0xff] %v3332_v55  ;;  %238 = vmatmul.f32.gmra.mxu3 %v3262_v22  ;;  %290 = vmatpush.msrb.mxu1 %v3238_v4  ;;  %v3369_v4 = vand.u32 4294901760, %v370_v54  ;;  %v3384_v18 = vsub.f32 %v89_v59, %v3365_v9  ;;  %v3392_v21 = vand.u32 4294901760, %v376_v5  ;;  %v388_v23 = vsub.f32 %v3339_v57, %v3360_v7 }
  0x25   :  { %4268 = vst [vmem:[#allocation28_spill] sm:$0xff] %v3335_v56  ;;  %307 = vmatpush.msrb.mxu2 %v3271_v27  ;;  %459 = vmatpush.msra.mxu0 %v3280_v34  ;;  %v3397_v28 = vand.u32 4294901760, %v3381_v17  ;;  %v3400_v29 = vsub.f32 %v88_v60, %v3367_v13  ;;  %v3405_v30 = vand.u32 4294901760, %v382_v14  ;;  %v394_v31 = vsub.f32 %v3347_v63, %v3377_v16 }
  0x26   :  { %4269 = vst [vmem:[#allocation29_spill] sm:$0xff] %v3339_v57  ;;  %514 = vmatpush.msra.mxu1 %v3265_v24  ;;  %360 = vmatpush.msrb.mxu3 %v3344_v62  ;;  %v3410_v32 = vand.u32 4294901760, %v3384_v18  ;;  %v3413_v37 = vsub.f32 %v87_v6, %v3386_v19  ;;  %v3419_v38 = vand.u32 4294901760, %v388_v23  ;;  %v86_v23 = vld [vmem:[#allocation5 + $0x18] sm:$0xff] }
  0x27   :  { %4270 = vst [vmem:[#allocation30_spill] sm:$0xff] %v3347_v63  ;;  %309 = vmatpush.msrb.mxu2 %v3293_v41  ;;  %462 = vmatpush.msra.mxu0 %v3283_v35  ;;  %v400_v40 = vsub.f32 %v3381_v17, %v3397_v28  ;;  %v3424_v51 = vand.u32 4294901760, %v3400_v29  ;;  %v3430_v52 = vand.u32 4294901760, %v394_v31  ;;  %v3478_v31 = vand.u32 4294901760, %v86_v23 }
  0x28   :  { %4271 = vst [vmem:[#allocation31_spill] sm:$0xff] %v3360_v7  ;;  %141 = vmatmul.f32.gmra.mxu0 %v3350_v2  ;;  %516 = vmatpush.msra.mxu1 %v3267_v25  ;;  %v406_v53 = vsub.f32 %v3384_v18, %v3410_v32  ;;  %v3435_v54 = vand.u32 4294901760, %v3413_v37 }
  0x29   :  { %4272 = vst [vmem:[#allocation32_spill] sm:$0xff] %v3367_v13  ;;  %176 = vmatmul.f32.gmra.mxu1 %v3248_v11  ;;  %366 = vmatpush.msrb.mxu3 %v3354_v3  ;;  %v3442_v58 = vand.u32 4294901760, %v400_v40  ;;  %v412_v59 = vsub.f32 %v3400_v29, %v3424_v51  ;;  %v85_v40 = vld [vmem:[#allocation5 + $0x10] sm:$0xff] }
  0x2a   :  { %4273 = vst [vmem:[#allocation33_spill] sm:$0xff] %v3377_v16  ;;  %311 = vmatpush.msrb.mxu2 %v3295_v42  ;;  %518 = vmatpush.msra.mxu1 %v3269_v26  ;;  %v3449_v60 = vand.u32 4294901760, %v406_v53  ;;  %v418_v5 = vsub.f32 %v3413_v37, %v3435_v54  ;;  %v3481_v53 = vsub.f32 %v86_v23, %v3478_v31  ;;  %v83_v23 = vld [vmem:[#allocation5] sm:$0xff] }
  0x2b   :  { %4274 = vst [vmem:[#allocation34_spill] sm:$0xff] %v3381_v17  ;;  %372 = vmatpush.msrb.mxu3 %v3369_v4  ;;  %465 = vmatpush.msra.mxu0 %v3286_v36  ;;  %v3457_v6 = vand.u32 4294901760, %v412_v59  ;;  %v3483_v59 = vand.u32 4294901760, %v85_v40 }
  0x2c   :  { %4275 = vst [vmem:[#allocation35_spill] sm:$0xff] %v3384_v18  ;;  %313 = vmatpush.msrb.mxu2 %v3317_v49  ;;  %520 = vmatpush.msra.mxu1 %v3271_v27  ;;  %v3463_v14 = vand.u32 4294901760, %v418_v5  ;;  %v84_v5 = vld [vmem:[#allocation5 + $0x8] sm:$0xff]  ;;  %v3488_v1 = vand.u32 4294901760, %v3481_v53 }
  0x2d   :  { %4276 = vst [vmem:[#allocation36_spill] sm:$0xff] %v3386_v19  ;;  %378 = vmatpush.msrb.mxu3 %v3392_v21  ;;  %468 = vmatpush.msra.mxu0 %v3312_v47  ;;  %v3491_v0 = vsub.f32 %v85_v40, %v3483_v59  ;;  %v3506_v40 = vand.u32 4294901760, %v83_v23 }
  0x2e   :  { %4277 = vst [vmem:[#allocation37_spill] sm:$0xff] %v3397_v28  ;;  %315 = vmatpush.msrb.mxu2 %v3319_v50  ;;  %522 = vmatpush.msra.mxu1 %v3293_v41 }
  0x2f   :  { %4278 = vst [vmem:[#allocation38_spill] sm:$0xff] %v3400_v29  ;;  %384 = vmatpush.msrb.mxu3 %v3405_v30  ;;  %471 = vmatpush.msra.mxu0 %v3315_v48 }
  0x30   :  { %4279 = vst [vmem:[#allocation39_spill] sm:$0xff] %v3410_v32  ;;  %265 = vmatmul.f32.vlgmr.msrb.gmra.mxu0 %v3246_v10  ;;  %317 = vmatpush.msrb.mxu2 %v3363_v8 }
  0x31   :  { %4280 = vst [vmem:[#allocation40_spill] sm:$0xff] %v3413_v37  ;;  %292 = vmatmul.f32.vlgmr.msrb.gmra.mxu1 %v3246_v10  ;;  %390 = vmatpush.msrb.mxu3 %v3419_v38 }
  0x32   :  { %4281 = vst [vmem:[#allocation41_spill] sm:$0xff] %v3424_v51  ;;  %319 = vmatpush.msrb.mxu2 %v3365_v9  ;;  %524 = vmatpush.msra.mxu1 %v3295_v42 }
  0x33   :  { %4282 = vst [vmem:[#allocation42_spill] sm:$0xff] %v3435_v54  ;;  %396 = vmatpush.msrb.mxu3 %v3430_v52  ;;  %474 = vmatpush.msra.mxu0 %v3339_v57 }
  0x34   :  { %321 = vmatpush.msrb.mxu2 %v3367_v13  ;;  %4283 = vst [vmem:[#allocation43_spill] sm:$0xff] %v3457_v6  ;;  %526 = vmatpush.msra.mxu1 %v3317_v49 }
  0x35   :  { %402 = vmatpush.msrb.mxu3 %v3442_v58  ;;  %477 = vmatpush.msra.mxu0 %v3347_v63  ;;  %4284 = vst [vmem:[#allocation44_spill] sm:$0xff] %v3463_v14 }
  0x36   :  { %323 = vmatpush.msrb.mxu2 %v3386_v19  ;;  %528 = vmatpush.msra.mxu1 %v3319_v50  ;;  %4285 = vst [vmem:[#allocation45_spill] sm:$0xff] %v3478_v31 }
  0x37   :  { %408 = vmatpush.msrb.mxu3 %v3449_v60  ;;  %480 = vmatpush.msra.mxu0 %v3381_v17  ;;  %4286 = vst [vmem:[#allocation46_spill] sm:$0xff] %v3481_v53 }
  0x38   :  { %269 = vmatmul.f32.gmra.mxu0 %v3248_v11  ;;  %530 = vmatpush.msra.mxu1 %v3363_v8  ;;  %4287 = vst [vmem:[#allocation47_spill] sm:$0xff] %v3483_v59 }
  0x39   :  { %296 = vmatmul.f32.gmra.mxu1 %v3248_v11  ;;  %414 = vmatpush.msrb.mxu3 %v3457_v6  ;;  %4288 = vst [vmem:[#allocation48_spill] sm:$0xff] %v3488_v1 }
  0x3a   :  { %483 = vmatpush.msra.mxu0 %v3384_v18  ;;  %532 = vmatpush.msra.mxu1 %v3365_v9  ;;  %4289 = vst [vmem:[#allocation49_spill] sm:$0xff] %v3491_v0  ;;  %v3501_v18 = vand.u32 4294901760, %v3491_v0 }
  0x3b   :  { %420 = vmatpush.msrb.mxu3 %v3463_v14  ;;  %325 = vmatpush.msrb.mxu2 %v3478_v31  ;;  %4293 = vst [vmem:[#allocation53_spill] sm:$0xff] %v3506_v40  ;;  %v3519_v14 = vsub.f32 %v83_v23, %v3506_v40 }
  0x3c   :  { %486 = vmatpush.msra.mxu0 %v3400_v29  ;;  %534 = vmatpush.msra.mxu1 %v3367_v13  ;;  %v424_v29 = vsub.f32 %v3481_v53, %v3488_v1  ;;  %4291 = vst [vmem:[#allocation51_spill] sm:$0xff] %v3501_v18  ;;  %v430_v22 = vsub.f32 %v3491_v0, %v3501_v18 }
  0x3d   :  { %327 = vmatpush.msrb.mxu2 %v3483_v59  ;;  %4296 = vst [vmem:[#allocation56_spill] sm:$0xff] %v3519_v14 }
  0x3e   :  { %489 = vmatpush.msra.mxu0 %v3413_v37  ;;  %536 = vmatpush.msra.mxu1 %v3386_v19  ;;  %v3493_v37 = vand.u32 4294901760, %v84_v5  ;;  %v3511_v63 = vand.u32 4294901760, %v424_v29  ;;  %v3526_v29 = vand.u32 4294901760, %v430_v22 }
  0x40   :  { %538 = vmatpush.msra.mxu1 %v3478_v31  ;;  %4290 = vst [vmem:[#allocation50_spill] sm:$0xff] %v3493_v37  ;;  %492 = vmatpush.msra.mxu0 %v3481_v53  ;;  %v3504_v17 = vsub.f32 %v84_v5, %v3493_v37 }
  0x41   :  { %329 = vmatpush.msrb.mxu2 %v3493_v37  ;;  %4294 = vst [vmem:[#allocation54_spill] sm:$0xff] %v3511_v63  ;;  %426 = vmatpush.msrb.mxu3 %v3511_v63 }
  0x42   :  { %540 = vmatpush.msra.mxu1 %v3483_v59  ;;  %4292 = vst [vmem:[#allocation52_spill] sm:$0xff] %v3504_v17  ;;  %495 = vmatpush.msra.mxu0 %v3491_v0  ;;  %v3516_v53 = vand.u32 4294901760, %v3504_v17  ;;  %v3531_v0 = vand.u32 4294901760, %v3519_v14 }
  0x43   :  { %331 = vmatpush.msrb.mxu2 %v3506_v40  ;;  %4297 = vst [vmem:[#allocation57_spill] sm:$0xff] %v3526_v29  ;;  %432 = vmatpush.msrb.mxu3 %v3526_v29 }
  0x44   :  { %542 = vmatpush.msra.mxu1 %v3493_v37  ;;  %4295 = vst [vmem:[#allocation55_spill] sm:$0xff] %v3516_v53  ;;  %498 = vmatpush.msra.mxu0 %v3504_v17  ;;  %v436_v5 = vsub.f32 %v3504_v17, %v3516_v53 }
  0x45   :  { %561 = vmatpush.msra.mxu2 %v3298_v43  ;;  %4298 = vst [vmem:[#allocation58_spill] sm:$0xff] %v3531_v0  ;;  %v442_v43 = vsub.f32 %v3519_v14, %v3531_v0 }
  0x46   :  { %544 = vmatpush.msra.mxu1 %v3506_v40  ;;  %501 = vmatpush.msra.mxu0 %v3519_v14  ;;  %v3536_v23 = vand.u32 4294901760, %v436_v5 }
  0x47   :  { %565 = vmatpush.msra.mxu2 %v3301_v44  ;;  %v3542_v22 = vand.u32 4294901760, %v442_v43  ;;  %v3568_v43 = vld [vmem:[#allocation8 + $0x8] sm:$0xff] }
  0x48   :  { %4299 = vst [vmem:[#allocation59_spill] sm:$0xff] %v3536_v23  ;;  %438 = vmatpush.msrb.mxu3 %v3536_v23  ;;  %v688_v5 = vand.u32 4294901760, %v3568_v43 }
  0x49   :  { %569 = vmatpush.msra.mxu2 %v3304_v45  ;;  %4300 = vst [vmem:[#allocation60_spill] sm:$0xff] %v3542_v22 }
  0x4a   :  { %444 = vmatpush.msrb.mxu3 %v3542_v22  ;;  %4301 = vst [vmem:[#allocation61_spill] sm:$0xff] %v3568_v43  ;;  %689 = vmatpush.msrb.mxu0 %v688_v5 }
  0x4b   :  { %573 = vmatpush.msra.mxu2 %v3307_v46 }
  0x4c   :  { %632 = vmatpush.msra.mxu3 %v3265_v24 }
  0x4d   :  { %577 = vmatpush.msra.mxu2 %v3332_v55 }
  0x4e   :  { %634 = vmatpush.msra.mxu3 %v3267_v25 }
  0x4f   :  { %581 = vmatpush.msra.mxu2 %v3335_v56 }
  0x50   :  { %636 = vmatpush.msra.mxu3 %v3269_v26 }
  0x51   :  { %585 = vmatpush.msra.mxu2 %v3360_v7 }
  0x52   :  { %638 = vmatpush.msra.mxu3 %v3271_v27 }
  0x53   :  { %589 = vmatpush.msra.mxu2 %v3377_v16 }
  0x54   :  { %640 = vmatpush.msra.mxu3 %v3293_v41 }
  0x55   :  { %593 = vmatpush.msra.mxu2 %v3397_v28 }
  0x56   :  { %642 = vmatpush.msra.mxu3 %v3295_v42 }
  0x57   :  { %597 = vmatpush.msra.mxu2 %v3410_v32 }
  0x58   :  { %644 = vmatpush.msra.mxu3 %v3317_v49 }
  0x59   :  { %601 = vmatpush.msra.mxu2 %v3424_v51 }
  0x5a   :  { %646 = vmatpush.msra.mxu3 %v3319_v50 }
  0x5b   :  { %605 = vmatpush.msra.mxu2 %v3435_v54  ;;  %v3573_v54 = vld [vmem:[#allocation8] sm:$0xff] }
  0x5c   :  { %648 = vmatpush.msra.mxu3 %v3363_v8  ;;  %4302 = vst [vmem:[#allocation62_spill] sm:$0xff] %v3573_v54 }
  0x5d   :  { %609 = vmatpush.msra.mxu2 %v3488_v1  ;;  %v690_v1 = vand.u32 4294901760, %v3573_v54 }
  0x5e   :  { %650 = vmatpush.msra.mxu3 %v3365_v9 }
  0x5f   :  { %613 = vmatpush.msra.mxu2 %v3501_v18  ;;  %v724_v18 = vsub.f32 %v3568_v43, %v688_v5  ;;  %691 = vmatpush.msrb.mxu0 %v690_v1  ;;  %v730_v28 = vsub.f32 %v3573_v54, %v690_v1 }
  0x60   :  { %652 = vmatpush.msra.mxu3 %v3367_v13 }
  0x61   :  { %617 = vmatpush.msra.mxu2 %v3516_v53  ;;  %v725_v53 = vand.u32 4294901760, %v724_v18 }
  0x62   :  { %654 = vmatpush.msra.mxu3 %v3386_v19 }
  0x63   :  { %621 = vmatpush.msra.mxu2 %v3531_v0  ;;  %v726_v16 = vsub.f32 %v724_v18, %v725_v53  ;;  %v731_v0 = vand.u32 4294901760, %v730_v28 }
  0x64   :  { %656 = vmatpush.msra.mxu3 %v3478_v31 }
  0x65   :  { %v727_v56 = vand.u32 4294901760, %v726_v16  ;;  %v732_v55 = vsub.f32 %v730_v28, %v731_v0 }
  0x66   :  { %658 = vmatpush.msra.mxu3 %v3483_v59 }
  0x67   :  { %728 = vmatpush.msrb.mxu1 %v727_v56  ;;  %v733_v46 = vand.u32 4294901760, %v732_v55 }
  0x68   :  { %660 = vmatpush.msra.mxu3 %v3493_v37 }
  0x69   :  { %734 = vmatpush.msrb.mxu1 %v733_v46 }
  0x6a   :  { %662 = vmatpush.msra.mxu3 %v3506_v40 }
  0x9d   :  { %v134_v51 = vpop.f32.mrf.mxu0 }
  0x9e   :  { %v173_v32 = vpop.f32.mrf.mxu1  ;;  %v203_v7 = vpop.f32.mrf.mxu2 }
  0x9f   :  { %v174_v14 = vadd.f32 %v173_v32, %v134_v51  ;;  %v233_v45 = vpop.f32.mrf.mxu3 }
  0xa1   :  { %v204_v44 = vadd.f32 %v203_v7, %v174_v14  ;;  %v4309_v14 = vld [vmem:[#allocation45_spill] sm:$0xff] }
  0xa3   :  { %v234_v22 = vadd.f32 %v233_v45, %v204_v44 }
  0xa5   :  { %v142_v43 = vpop.f32.mrf.mxu0 }
  0xa6   :  { %v177_v17 = vpop.f32.mrf.mxu1  ;;  %v208_v54 = vpop.f32.mrf.mxu2 }
  0xa7   :  { %v178_v23 = vadd.f32 %v177_v17, %v142_v43  ;;  %v239_v16 = vpop.f32.mrf.mxu3  ;;  %v4317_v43 = vld [vmem:[#allocation38_spill] sm:$0xff] }
  0xa9   :  { %v209_v31 = vadd.f32 %v208_v54, %v178_v23  ;;  %v4315_v23 = vld [vmem:[#allocation50_spill] sm:$0xff] }
  0xab   :  { %v240_v40 = vadd.f32 %v239_v16, %v209_v31  ;;  %v4310_v31 = vld [vmem:[#allocation34_spill] sm:$0xff]  ;;  %v4319_v16 = vld [vmem:[#allocation40_spill] sm:$0xff] }
  0xad   :  { %v266_v59 = vpop.f32.mrf.mxu0 }
  0xae   :  { %v267_v29 = vadd.f32 %v266_v59, %v234_v22  ;;  %v293_v37 = vpop.f32.mrf.mxu1  ;;  %v4312_v59 = vld [vmem:[#allocation47_spill] sm:$0xff]  ;;  %v4316_v22 = vld [vmem:[#allocation60_spill] sm:$0xff] }
  0xb0   :  { %v294_v63 = vadd.f32 %v293_v37, %v267_v29  ;;  %v4314_v29 = vld [vmem:[#allocation35_spill] sm:$0xff] }
  0xb2   :  { %v332_v19 = vand.u32 4294901760, %v294_v63 }
  0xb4   :  { %v333_v15 = vsub.f32 %v294_v63, %v332_v19  ;;  %446 = vmatmul.f32.vlgmr.msrb.gmra.mxu3 %v332_v19 }
  0xb5   :  { %v270_v32 = vpop.f32.mrf.mxu0  ;;  %852 = vmatpush.msrb.mxu3 %v688_v5 }
  0xb6   :  { %v271_v55 = vadd.f32 %v270_v32, %v240_v40  ;;  %504 = vmatmul.f32.vlgmr.msra.gmra.mxu0 %v333_v15  ;;  %v297_v56 = vpop.f32.mrf.mxu1  ;;  %v334_v46 = vand.u32 4294901760, %v333_v15  ;;  %v4313_v40 = vld [vmem:[#allocation59_spill] sm:$0xff]  ;;  %v4320_v32 = vld [vmem:[#allocation21_spill] sm:$0xff] }
  0xb7   :  { %760 = vmatpush.msra.mxu0 %v724_v18  ;;  %854 = vmatpush.msrb.mxu3 %v690_v1  ;;  %v4306_v18 = vld [vmem:[#allocation18_spill] sm:$0xff] }
  0xb8   :  { %v298_v44 = vadd.f32 %v297_v56, %v271_v55  ;;  %548 = vmatmul.f32.vlgmr.msra.gmra.mxu1 %v334_v46  ;;  %v335_v45 = vsub.f32 %v333_v15, %v334_v46  ;;  %v4305_v15 = vld [vmem:[#allocation36_spill] sm:$0xff]  ;;  %v4321_v55 = vld [vmem:[#allocation46_spill] sm:$0xff]  ;;  %v4323_v46 = vld [vmem:[#allocation49_spill] sm:$0xff] }
  0xb9   :  { %790 = vmatpush.msra.mxu1 %v688_v5  ;;  %763 = vmatpush.msra.mxu0 %v730_v28  ;;  %v4308_v28 = vld [vmem:[#allocation54_spill] sm:$0xff]  ;;  %v4318_v5 = vld [vmem:[#allocation53_spill] sm:$0xff] }
  0xba   :  { %v340_v7 = vand.u32 4294901760, %v298_v44  ;;  %v336_v17 = vand.u32 4294901760, %v335_v45  ;;  %v4322_v56 = vld [vmem:[#allocation22_spill] sm:$0xff]  ;;  %v4325_v45 = vld [vmem:[#allocation52_spill] sm:$0xff] }
  0xbb   :  { %792 = vmatpush.msra.mxu1 %v690_v1  ;;  %v4304_v1 = vld [vmem:[#allocation44_spill] sm:$0xff] }
  0xbc   :  { %v341_v37 = vsub.f32 %v298_v44, %v340_v7  ;;  %337 = vmatmul.f32.vlgmr.msrb.gmra.mxu2 %v336_v17  ;;  %450 = vmatmul.f32.gmra.mxu3 %v340_v7  ;;  %v4324_v44 = vld [vmem:[#allocation23_spill] sm:$0xff]  ;;  %v4327_v17 = vld [vmem:[#allocation56_spill] sm:$0xff] }
  0xbd   :  { %823 = vmatpush.msrb.mxu2 %v725_v53  ;;  %v4311_v53 = vld [vmem:[#allocation57_spill] sm:$0xff] }
  0xbe   :  { %509 = vmatmul.f32.gmra.mxu0 %v341_v37  ;;  %v342_v63 = vand.u32 4294901760, %v341_v37 }
  0xbf   :  { %827 = vmatpush.msrb.mxu2 %v731_v0  ;;  %v4303_v0 = vld [vmem:[#allocation17_spill] sm:$0xff] }
  0xc0   :  { %554 = vmatmul.f32.gmra.mxu1 %v342_v63  ;;  %v343_v51 = vsub.f32 %v341_v37, %v342_v63  ;;  %v4328_v37 = vld [vmem:[#allocation27_spill] sm:$0xff]  ;;  %v4329_v63 = vld [vmem:[#allocation28_spill] sm:$0xff] }
  0xc2   :  { %v344_v54 = vand.u32 4294901760, %v343_v51  ;;  %v4330_v51 = vld [vmem:[#allocation31_spill] sm:$0xff] }
  0xc4   :  { %345 = vmatmul.f32.gmra.mxu2 %v344_v54  ;;  %664 = vmatmul.f32.vlgmr.msra.gmra.mxu3 %v332_v19  ;;  %v4331_v54 = vld [vmem:[#allocation33_spill] sm:$0xff] }
  0xc5   :  { %1078 = vmatpush.msra.mxu3 %v3265_v24 }
  0xc6   :  { %697 = vmatmul.f32.vlgmr.msrb.gmra.mxu0 %v3289_v39 }
  0xc7   :  { %865 = vmatpush.msrb.mxu0 %v3265_v24  ;;  %1080 = vmatpush.msra.mxu3 %v3267_v25 }
  0xc8   :  { %736 = vmatmul.f32.vlgmr.msrb.gmra.mxu1 %v3246_v10 }
  0xc9   :  { %918 = vmatpush.msrb.mxu1 %v3342_v61  ;;  %867 = vmatpush.msrb.mxu0 %v3267_v25 }
  0xca   :  { %1082 = vmatpush.msra.mxu3 %v3269_v26 }
  0xcb   :  { %924 = vmatpush.msrb.mxu1 %v3344_v62  ;;  %869 = vmatpush.msrb.mxu0 %v3269_v26 }
  0xcc   :  { %623 = vmatmul.f32.vlgmr.msra.gmra.mxu2 %v332_v19  ;;  %668 = vmatmul.f32.gmra.mxu3 %v340_v7  ;;  %v4307_v19 = vld [vmem:[#allocation30_spill] sm:$0xff] }
  0xcd   :  { %930 = vmatpush.msrb.mxu1 %v3354_v3  ;;  %871 = vmatpush.msrb.mxu0 %v3271_v27 }
  0xce   :  { %705 = vmatmul.f32.gmra.mxu0 %v3350_v2  ;;  %1020 = vmatpush.msra.mxu2 %v3277_v33 }
  0xcf   :  { %936 = vmatpush.msrb.mxu1 %v3369_v4  ;;  %873 = vmatpush.msrb.mxu0 %v3293_v41 }
  0xd0   :  { %740 = vmatmul.f32.gmra.mxu1 %v3248_v11  ;;  %1023 = vmatpush.msra.mxu2 %v3280_v34 }
  0xd1   :  { %942 = vmatpush.msrb.mxu1 %v3392_v21  ;;  %875 = vmatpush.msrb.mxu0 %v3295_v42 }
  0xd2   :  { %1026 = vmatpush.msra.mxu2 %v3283_v35  ;;  %1084 = vmatpush.msra.mxu3 %v3271_v27 }
  0xd3   :  { %948 = vmatpush.msrb.mxu1 %v3405_v30  ;;  %877 = vmatpush.msrb.mxu0 %v3317_v49 }
  0xd4   :  { %627 = vmatmul.f32.gmra.mxu2 %v340_v7  ;;  %856 = vmatmul.f32.vlgmr.msrb.gmra.mxu3 %v3246_v10  ;;  %v4326_v7 = vld [vmem:[#allocation24_spill] sm:$0xff] }
  0xd5   :  { %954 = vmatpush.msrb.mxu1 %v3419_v38  ;;  %879 = vmatpush.msrb.mxu0 %v3319_v50 }
  0xd6   :  { %766 = vmatmul.f32.vlgmr.msra.gmra.mxu0 %v3251_v12  ;;  %1029 = vmatpush.msra.mxu2 %v3286_v36 }
  0xd7   :  { %960 = vmatpush.msrb.mxu1 %v3430_v52  ;;  %881 = vmatpush.msrb.mxu0 %v3363_v8 }
  0xd8   :  { %796 = vmatmul.f32.vlgmr.msra.gmra.mxu1 %v3259_v20  ;;  %1032 = vmatpush.msra.mxu2 %v3312_v47 }
  0xd9   :  { %966 = vmatpush.msrb.mxu1 %v3442_v58  ;;  %883 = vmatpush.msrb.mxu0 %v3365_v9 }
  0xda   :  { %1035 = vmatpush.msra.mxu2 %v3315_v48  ;;  %1086 = vmatpush.msra.mxu3 %v3293_v41 }
  0xdb   :  { %972 = vmatpush.msrb.mxu1 %v3449_v60  ;;  %885 = vmatpush.msrb.mxu0 %v3367_v13 }
  0xdc   :  { %829 = vmatmul.f32.vlgmr.msrb.gmra.mxu2 %v3246_v10  ;;  %860 = vmatmul.f32.gmra.mxu3 %v3248_v11 }
  0xdd   :  { %978 = vmatpush.msrb.mxu1 %v3457_v6  ;;  %1038 = vmatpush.msra.mxu2 %v3339_v57 }
  0xde   :  { %771 = vmatmul.f32.gmra.mxu0 %v4303_v0  ;;  %1088 = vmatpush.msra.mxu3 %v3295_v42 }
  0xdf   :  { %984 = vmatpush.msrb.mxu1 %v4304_v1  ;;  %887 = vmatpush.msrb.mxu0 %v4305_v15 }
  0xe0   :  { %802 = vmatmul.f32.gmra.mxu1 %v4306_v18  ;;  %1041 = vmatpush.msra.mxu2 %v4307_v19 }
  0xe1   :  { %990 = vmatpush.msrb.mxu1 %v4308_v28  ;;  %1090 = vmatpush.msra.mxu3 %v3317_v49 }
  0xe2   :  { %889 = vmatpush.msrb.mxu0 %v4309_v14  ;;  %1044 = vmatpush.msra.mxu2 %v4310_v31 }
  0xe3   :  { %996 = vmatpush.msrb.mxu1 %v4311_v53  ;;  %1092 = vmatpush.msra.mxu3 %v3319_v50 }
  0xe4   :  { %833 = vmatmul.f32.gmra.mxu2 %v3248_v11  ;;  %891 = vmatpush.msrb.mxu0 %v4312_v59 }
  0xe5   :  { %1002 = vmatpush.msrb.mxu1 %v4313_v40  ;;  %1047 = vmatpush.msra.mxu2 %v4314_v29 }
  0xe6   :  { %1094 = vmatpush.msra.mxu3 %v3363_v8  ;;  %893 = vmatpush.msrb.mxu0 %v4315_v23 }
  0xe7   :  { %1008 = vmatpush.msrb.mxu1 %v4316_v22  ;;  %1050 = vmatpush.msra.mxu2 %v4317_v43  ;;  %v4344_v43 = vld [vmem:[#allocation15_spill] sm:$0xff] }
  0xe8   :  { %1096 = vmatpush.msra.mxu3 %v3365_v9  ;;  %895 = vmatpush.msrb.mxu0 %v4318_v5 }
  0xe9   :  { %1196 = vmatpush.msra.mxu1 %v3265_v24  ;;  %1053 = vmatpush.msra.mxu2 %v4319_v16 }
  0xea   :  { %1098 = vmatpush.msra.mxu3 %v3367_v13  ;;  %1125 = vmatpush.msra.mxu0 %v4320_v32  ;;  %v1239_v32 = vmul.f32 %v4344_v43, %v4344_v43 }
  0xeb   :  { %1198 = vmatpush.msra.mxu1 %v3267_v25  ;;  %1056 = vmatpush.msra.mxu2 %v4321_v55 }
  0xec   :  { %1100 = vmatpush.msra.mxu3 %v4305_v15  ;;  %1129 = vmatpush.msra.mxu0 %v4322_v56 }
  0xed   :  { %1200 = vmatpush.msra.mxu1 %v3269_v26  ;;  %1059 = vmatpush.msra.mxu2 %v4323_v46 }
  0xee   :  { %1102 = vmatpush.msra.mxu3 %v4309_v14  ;;  %1133 = vmatpush.msra.mxu0 %v4324_v44 }
  0xef   :  { %1202 = vmatpush.msra.mxu1 %v3271_v27  ;;  %1062 = vmatpush.msra.mxu2 %v4325_v45  ;;  %v4333_v45 = vld [vmem:[#allocation39_spill] sm:$0xff] }
  0xf0   :  { %1104 = vmatpush.msra.mxu3 %v4312_v59  ;;  %1137 = vmatpush.msra.mxu0 %v4326_v7 }
  0xf1   :  { %1204 = vmatpush.msra.mxu1 %v3293_v41  ;;  %1065 = vmatpush.msra.mxu2 %v4327_v17  ;;  %v4332_v17 = vld [vmem:[#allocation37_spill] sm:$0xff] }
  0xf2   :  { %1106 = vmatpush.msra.mxu3 %v4315_v23  ;;  %1141 = vmatpush.msra.mxu0 %v4328_v37  ;;  %v4334_v37 = vld [vmem:[#allocation41_spill] sm:$0xff] }
  0xf3   :  { %1206 = vmatpush.msra.mxu1 %v3295_v42 }
  0xf4   :  { %1108 = vmatpush.msra.mxu3 %v4318_v5  ;;  %1145 = vmatpush.msra.mxu0 %v4329_v63  ;;  %v4335_v63 = vld [vmem:[#allocation42_spill] sm:$0xff] }
  0xf5   :  { %1208 = vmatpush.msra.mxu1 %v3317_v49 }
  0xf6   :  { %1149 = vmatpush.msra.mxu0 %v4330_v51  ;;  %v4336_v51 = vld [vmem:[#allocation48_spill] sm:$0xff] }
  0xf7   :  { %1210 = vmatpush.msra.mxu1 %v3319_v50 }
  0xf8   :  { %1153 = vmatpush.msra.mxu0 %v4331_v54  ;;  %v4337_v54 = vld [vmem:[#allocation51_spill] sm:$0xff] }
  0xf9   :  { %1212 = vmatpush.msra.mxu1 %v3363_v8 }
  0xfa   :  { %1157 = vmatpush.msra.mxu0 %v4332_v17  ;;  %v4338_v17 = vld [vmem:[#allocation55_spill] sm:$0xff] }
  0xfb   :  { %1214 = vmatpush.msra.mxu1 %v3365_v9 }
  0xfc   :  { %1161 = vmatpush.msra.mxu0 %v4333_v45  ;;  %v4339_v45 = vld [vmem:[#allocation58_spill] sm:$0xff] }
  0xfd   :  { %1216 = vmatpush.msra.mxu1 %v3367_v13 }
  0xfe   :  { %1165 = vmatpush.msra.mxu0 %v4334_v37 }
  0xff   :  { %1218 = vmatpush.msra.mxu1 %v4305_v15 }
 0x100   :  { %1169 = vmatpush.msra.mxu0 %v4335_v63 }
 0x101   :  { %1220 = vmatpush.msra.mxu1 %v4309_v14 }
 0x102   :  { %1173 = vmatpush.msra.mxu0 %v4336_v51 }
 0x103   :  { %1222 = vmatpush.msra.mxu1 %v4312_v59 }
 0x104   :  { %1177 = vmatpush.msra.mxu0 %v4337_v54 }
 0x105   :  { %1224 = vmatpush.msra.mxu1 %v4315_v23 }
 0x106   :  { %1181 = vmatpush.msra.mxu0 %v4338_v17  ;;  %v4345_v17 = vld [vmem:[#allocation16_spill] sm:$0xff] }
 0x107   :  { %1226 = vmatpush.msra.mxu1 %v4318_v5 }
 0x108   :  { %1185 = vmatpush.msra.mxu0 %v4339_v45  ;;  %v1238_v45 = vmul.f32 %v4345_v17, %v4345_v17 }
 0x10a   :  { %v3712_v23 = vand.u32 4294901760, %v1238_v45 }
 0x10c   :  { %v3717_v17 = vsub.f32 %v1238_v45, %v3712_v23 }
 0x133   :  { %v3690_v46 = vpop.f32.mrf.mxu0 }
 0x134   :  { %4340 = vst [vmem:[#allocation63_spill] sm:$0xff] %v3690_v46 }
 0x135   :  { %v3692_v37 = vpop.f32.mrf.mxu1 }
 0x136   :  { %4341 = vst [vmem:[#allocation64_spill] sm:$0xff] %v3692_v37  ;;  %v3704_v37 = vand.u32 4294901760, %v1239_v32 }
 0x137   :  { %v3694_v7 = vpop.f32.mrf.mxu3 }
 0x138   :  { %4342 = vst [vmem:[#allocation65_spill] sm:$0xff] %v3694_v7  ;;  %3027 = vmatpush.msrb.mxu2 %v3704_v37 }
 0x13a   :  { %3028 = vmatpush.msrb.mxu2 %v3712_v23 }
 0x13b   :  { %v510_v63 = vpop.f32.mrf.mxu0 }
 0x13d   :  { %v555_v55 = vpop.f32.mrf.mxu1 }
 0x13f   :  { %v3696_v44 = vpop.f32.mrf.mxu2  ;;  %v451_v51 = vpop.f32.mrf.mxu3 }
 0x140   :  { %4343 = vst [vmem:[#allocation66_spill] sm:$0xff] %v3696_v44  ;;  %v3710_v44 = vsub.f32 %v1239_v32, %v3704_v37 }
 0x142   :  { %v4227_v43 = vand.u32 4294901760, %v3710_v44 }
 0x143   :  { %v698_v16 = vpop.f32.mrf.mxu0 }
 0x145   :  { %v737_v56 = vpop.f32.mrf.mxu1 }
 0x146   :  { %v738_v45 = vadd.f32 %v737_v56, %v698_v16  ;;  %v4352_v16 = vld [vmem:[#allocation54_spill] sm:$0xff]  ;;  %v4353_v56 = vld [vmem:[#allocation36_spill] sm:$0xff] }
 0x147   :  { %v346_v54 = vpop.f32.mrf.mxu2  ;;  %v3702_v29 = vpop.f32.mrf.mxu3 }
 0x148   :  { %4346 = vst [vmem:[#allocation15_spill] sm:$0xff] %v3702_v29  ;;  %v452_v7 = vadd.f32 %v451_v51, %v346_v54  ;;  %v1292_v51 = vsub.f32 %v3710_v44, %v4227_v43  ;;  %v4235_v54 = vand.u32 4294901760, %v3717_v17 }
 0x14a   :  { %v511_v29 = vadd.f32 %v510_v63, %v452_v7  ;;  %v1293_v32 = vand.u32 4294901760, %v1292_v51  ;;  %v1298_v59 = vsub.f32 %v3717_v17, %v4235_v54 }
 0x14b   :  { %v706_v46 = vpop.f32.mrf.mxu0 }
 0x14c   :  { %v556_v57 = vadd.f32 %v555_v55, %v511_v29  ;;  %3029 = vmatpush.msrb.mxu3 %v1293_v32  ;;  %v1299_v48 = vand.u32 4294901760, %v1298_v59 }
 0x14d   :  { %v741_v5 = vpop.f32.mrf.mxu1 }
 0x14e   :  { %3030 = vmatpush.msrb.mxu3 %v1299_v48  ;;  %v742_v51 = vadd.f32 %v741_v5, %v706_v46  ;;  %v4351_v5 = vld [vmem:[#allocation19_spill] sm:$0xff]  ;;  %v4354_v46 = vld [vmem:[#allocation20_spill] sm:$0xff] }
 0x14f   :  { %v3706_v31 = vpop.f32.mrf.mxu2 }
 0x150   :  { %4347 = vst [vmem:[#allocation16_spill] sm:$0xff] %v3706_v31  ;;  %v669_v31 = vpop.f32.mrf.mxu3 }
 0x153   :  { %v767_v19 = vpop.f32.mrf.mxu0 }
 0x154   :  { %v768_v63 = vadd.f32 %v767_v19, %v738_v45  ;;  %v4361_v45 = vld [vmem:[#allocation29_spill] sm:$0xff] }
 0x155   :  { %v797_v7 = vpop.f32.mrf.mxu1 }
 0x156   :  { %v798_v47 = vadd.f32 %v797_v7, %v768_v63  ;;  %v4362_v7 = vld [vmem:[#allocation47_spill] sm:$0xff]  ;;  %v4363_v63 = vld [vmem:[#allocation30_spill] sm:$0xff] }
 0x157   :  { %v628_v22 = vpop.f32.mrf.mxu2 }
 0x158   :  { %v629_v14 = vadd.f32 %v628_v22, %v556_v57  ;;  %v857_v43 = vpop.f32.mrf.mxu3 }
 0x15a   :  { %v3726_v40 = vadd.f32 %v669_v31, %v629_v14 }
 0x15b   :  { %v772_v53 = vpop.f32.mrf.mxu0 }
 0x15c   :  { %v773_v28 = vadd.f32 %v772_v53, %v742_v51  ;;  %v4349_v53 = vand.u32 4294901760, %v3717_v17  ;;  %v4364_v51 = vld [vmem:[#allocation50_spill] sm:$0xff] }
 0x15d   :  { %v803_v54 = vpop.f32.mrf.mxu1 }
 0x15e   :  { %v804_v55 = vadd.f32 %v803_v54, %v773_v28  ;;  %v4348_v28 = vand.u32 4294901760, %v3710_v44  ;;  %v4359_v54 = vld [vmem:[#allocation26_spill] sm:$0xff] }
 0x15f   :  { %v830_v36 = vpop.f32.mrf.mxu2 }
 0x160   :  { %v831_v15 = vadd.f32 %v830_v36, %v798_v47  ;;  %v861_v57 = vpop.f32.mrf.mxu3 }
 0x162   :  { %v858_v35 = vadd.f32 %v857_v43, %v831_v15  ;;  %v4357_v43 = vld [vmem:[#allocation59_spill] sm:$0xff] }
 0x164   :  { %v896_v29 = vand.u32 4294901760, %v858_v35 }
 0x166   :  { %v897_v13 = vsub.f32 %v858_v35, %v896_v29  ;;  %1010 = vmatmul.f32.vlgmr.msrb.gmra.mxu1 %v896_v29 }
 0x167   :  { %v834_v59 = vpop.f32.mrf.mxu2  ;;  %1294 = vmatpush.msrb.mxu1 %v1293_v32  ;;  %v4360_v32 = vld [vmem:[#allocation60_spill] sm:$0xff] }
 0x168   :  { %v898_v22 = vand.u32 4294901760, %v897_v13  ;;  %v835_v19 = vadd.f32 %v834_v59, %v804_v55  ;;  %1068 = vmatmul.f32.vlgmr.msra.gmra.mxu2 %v897_v13  ;;  %v4366_v55 = vld [vmem:[#allocation53_spill] sm:$0xff]  ;;  %v4367_v59 = vld [vmem:[#allocation35_spill] sm:$0xff] }
 0x169   :  { %1326 = vmatpush.msra.mxu2 %v3710_v44  ;;  %1300 = vmatpush.msrb.mxu1 %v1299_v48  ;;  %v4355_v44 = vld [vmem:[#allocation57_spill] sm:$0xff] }
 0x16a   :  { %v899_v14 = vsub.f32 %v897_v13, %v898_v22  ;;  %v862_v31 = vadd.f32 %v861_v57, %v835_v19  ;;  %1112 = vmatmul.f32.vlgmr.msra.gmra.mxu3 %v898_v22  ;;  %v4368_v57 = vld [vmem:[#allocation21_spill] sm:$0xff]  ;;  %v4369_v22 = vld [vmem:[#allocation38_spill] sm:$0xff] }
 0x16b   :  { %1329 = vmatpush.msra.mxu2 %v3717_v17  ;;  %1356 = vmatpush.msra.mxu3 %v3704_v37  ;;  %v4358_v17 = vld [vmem:[#allocation45_spill] sm:$0xff]  ;;  %v4370_v19 = vld [vmem:[#allocation22_spill] sm:$0xff] }
 0x16c   :  { %v904_v36 = vand.u32 4294901760, %v862_v31  ;;  %v900_v47 = vand.u32 4294901760, %v899_v14  ;;  %v4371_v14 = vld [vmem:[#allocation40_spill] sm:$0xff] }
 0x16d   :  { %1358 = vmatpush.msra.mxu3 %v3712_v23 }
 0x16e   :  { %v905_v35 = vsub.f32 %v862_v31, %v904_v36  ;;  %901 = vmatmul.f32.vlgmr.msrb.gmra.mxu0 %v900_v47  ;;  %1014 = vmatmul.f32.gmra.mxu1 %v904_v36  ;;  %v4372_v31 = vld [vmem:[#allocation23_spill] sm:$0xff]  ;;  %v4374_v47 = vld [vmem:[#allocation24_spill] sm:$0xff] }
 0x16f   :  { %1255 = vmatpush.msrb.mxu0 %v3704_v37 }
 0x170   :  { %1073 = vmatmul.f32.gmra.mxu2 %v905_v35  ;;  %v906_v15 = vand.u32 4294901760, %v905_v35 }
 0x171   :  { %1257 = vmatpush.msrb.mxu0 %v3712_v23 }
 0x172   :  { %1118 = vmatmul.f32.gmra.mxu3 %v906_v15  ;;  %v907_v48 = vsub.f32 %v905_v35, %v906_v15  ;;  %v4375_v35 = vld [vmem:[#allocation49_spill] sm:$0xff]  ;;  %v4376_v15 = vld [vmem:[#allocation27_spill] sm:$0xff] }
 0x174   :  { %v908_v13 = vand.u32 4294901760, %v907_v48  ;;  %v4377_v48 = vld [vmem:[#allocation52_spill] sm:$0xff] }
 0x176   :  { %909 = vmatmul.f32.gmra.mxu0 %v908_v13  ;;  %1228 = vmatmul.f32.vlgmr.msra.gmra.mxu1 %v896_v29  ;;  %v4378_v13 = vld [vmem:[#allocation28_spill] sm:$0xff] }
 0x177   :  { %1418 = vmatpush.msra.mxu1 %v3704_v37  ;;  %v4356_v37 = vld [vmem:[#allocation25_spill] sm:$0xff] }
 0x178   :  { %1271 = vmatmul.f32.vlgmr.msrb.gmra.mxu2 %v3350_v2 }
 0x179   :  { %1420 = vmatpush.msra.mxu1 %v3712_v23  ;;  %1431 = vmatpush.msrb.mxu2 %v3265_v24  ;;  %v4350_v23 = vld [vmem:[#allocation32_spill] sm:$0xff] }
 0x17a   :  { %1306 = vmatmul.f32.vlgmr.msrb.gmra.mxu3 %v3248_v11 }
 0x17b   :  { %1484 = vmatpush.msrb.mxu3 %v3342_v61  ;;  %1433 = vmatpush.msrb.mxu2 %v3267_v25 }
 0x17d   :  { %1490 = vmatpush.msrb.mxu3 %v3344_v62  ;;  %1435 = vmatpush.msrb.mxu2 %v3269_v26 }
 0x17e   :  { %1187 = vmatmul.f32.vlgmr.msra.gmra.mxu0 %v896_v29  ;;  %1232 = vmatmul.f32.gmra.mxu1 %v904_v36  ;;  %v4365_v29 = vld [vmem:[#allocation34_spill] sm:$0xff] }
 0x17f   :  { %1389 = vmatpush.msra.mxu0 %v4348_v28  ;;  %1496 = vmatpush.msrb.mxu3 %v3354_v3  ;;  %v4379_v28 = vld [vmem:[#allocation56_spill] sm:$0xff] }
 0x180   :  { %1332 = vmatmul.f32.vlgmr.msra.gmra.mxu2 %v3251_v12 }
 0x181   :  { %1393 = vmatpush.msra.mxu0 %v4349_v53  ;;  %1502 = vmatpush.msrb.mxu3 %v3369_v4  ;;  %v4380_v53 = vld [vmem:[#allocation31_spill] sm:$0xff] }
 0x182   :  { %1362 = vmatmul.f32.vlgmr.msra.gmra.mxu3 %v3259_v20  ;;  %1437 = vmatpush.msrb.mxu2 %v3271_v27 }
 0x183   :  { %1508 = vmatpush.msrb.mxu3 %v3392_v21 }
 0x184   :  { %1439 = vmatpush.msrb.mxu2 %v3293_v41 }
 0x185   :  { %1514 = vmatpush.msrb.mxu3 %v3405_v30 }
 0x186   :  { %1191 = vmatmul.f32.gmra.mxu0 %v904_v36  ;;  %1302 = vmatmul.f32.vlgmr.msrb.gmra.mxu1 %v3246_v10  ;;  %v4373_v36 = vld [vmem:[#allocation46_spill] sm:$0xff] }
 0x187   :  { %1520 = vmatpush.msrb.mxu3 %v3419_v38  ;;  %1441 = vmatpush.msrb.mxu2 %v3295_v42 }
 0x188   :  { %1337 = vmatmul.f32.gmra.mxu2 %v4303_v0  ;;  %1644 = vmatpush.msrb.mxu1 %v3265_v24 }
 0x189   :  { %1526 = vmatpush.msrb.mxu3 %v3430_v52  ;;  %1443 = vmatpush.msrb.mxu2 %v3317_v49 }
 0x18a   :  { %1368 = vmatmul.f32.gmra.mxu3 %v4306_v18  ;;  %1646 = vmatpush.msrb.mxu1 %v3267_v25 }
 0x18b   :  { %1532 = vmatpush.msrb.mxu3 %v3442_v58  ;;  %1445 = vmatpush.msrb.mxu2 %v3319_v50 }
 0x18c   :  { %1648 = vmatpush.msrb.mxu1 %v3269_v26 }
 0x18d   :  { %1538 = vmatpush.msrb.mxu3 %v3449_v60  ;;  %1447 = vmatpush.msrb.mxu2 %v3363_v8 }
 0x18e   :  { %1263 = vmatmul.f32.vlgmr.msrb.gmra.mxu0 %v3289_v39  ;;  %1422 = vmatmul.f32.vlgmr.msra.gmra.mxu1 %v3246_v10 }
 0x18f   :  { %1586 = vmatpush.msrb.mxu0 %v3277_v33  ;;  %1544 = vmatpush.msrb.mxu3 %v3457_v6 }
 0x190   :  { %1650 = vmatpush.msrb.mxu1 %v3271_v27  ;;  %1449 = vmatpush.msrb.mxu2 %v3365_v9 }
 0x191   :  { %1589 = vmatpush.msrb.mxu0 %v3280_v34  ;;  %1550 = vmatpush.msrb.mxu3 %v4304_v1 }
 0x192   :  { %1652 = vmatpush.msrb.mxu1 %v3293_v41  ;;  %1451 = vmatpush.msrb.mxu2 %v4350_v23 }
 0x193   :  { %1592 = vmatpush.msrb.mxu0 %v4351_v5  ;;  %1556 = vmatpush.msrb.mxu3 %v4352_v16 }
 0x194   :  { %1654 = vmatpush.msrb.mxu1 %v3295_v42  ;;  %1453 = vmatpush.msrb.mxu2 %v4353_v56 }
 0x195   :  { %1595 = vmatpush.msrb.mxu0 %v4354_v46  ;;  %1562 = vmatpush.msrb.mxu3 %v4355_v44  ;;  %v4391_v44 = vld [vmem:[#allocation61_spill] sm:$0xff] }
 0x196   :  { %1395 = vmatmul.f32.vlgmr.msra.gmra.mxu0 %v3246_v10  ;;  %1426 = vmatmul.f32.gmra.mxu1 %v3248_v11 }
 0x197   :  { %1598 = vmatpush.msrb.mxu0 %v4356_v37  ;;  %1568 = vmatpush.msrb.mxu3 %v4357_v43 }
 0x198   :  { %1656 = vmatpush.msrb.mxu1 %v3317_v49  ;;  %1455 = vmatpush.msrb.mxu2 %v4358_v17 }
 0x199   :  { %1601 = vmatpush.msrb.mxu0 %v4359_v54  ;;  %1574 = vmatpush.msrb.mxu3 %v4360_v32 }
 0x19a   :  { %1658 = vmatpush.msrb.mxu1 %v3319_v50  ;;  %1457 = vmatpush.msrb.mxu2 %v4362_v7 }
 0x19b   :  { %1762 = vmatpush.msra.mxu3 %v3265_v24  ;;  %1604 = vmatpush.msrb.mxu0 %v4361_v45 }
 0x19c   :  { %1660 = vmatpush.msrb.mxu1 %v3363_v8  ;;  %1459 = vmatpush.msrb.mxu2 %v4364_v51 }
 0x19d   :  { %1764 = vmatpush.msra.mxu3 %v3267_v25  ;;  %1607 = vmatpush.msrb.mxu0 %v4363_v63 }
 0x19e   :  { %1399 = vmatmul.f32.gmra.mxu0 %v3248_v11  ;;  %1662 = vmatpush.msrb.mxu1 %v3365_v9 }
 0x19f   :  { %1766 = vmatpush.msra.mxu3 %v3269_v26  ;;  %1610 = vmatpush.msrb.mxu0 %v4365_v29 }
 0x1a0   :  { %1461 = vmatpush.msrb.mxu2 %v4366_v55  ;;  %1664 = vmatpush.msrb.mxu1 %v4350_v23 }
 0x1a1   :  { %1768 = vmatpush.msra.mxu3 %v3271_v27  ;;  %1613 = vmatpush.msrb.mxu0 %v4367_v59 }
 0x1a2   :  { %1691 = vmatpush.msra.mxu2 %v4368_v57  ;;  %1666 = vmatpush.msrb.mxu1 %v4353_v56 }
 0x1a3   :  { %1770 = vmatpush.msra.mxu3 %v3293_v41  ;;  %1616 = vmatpush.msrb.mxu0 %v4369_v22 }
 0x1a4   :  { %1695 = vmatpush.msra.mxu2 %v4370_v19  ;;  %1668 = vmatpush.msrb.mxu1 %v4358_v17 }
 0x1a5   :  { %1772 = vmatpush.msra.mxu3 %v3295_v42  ;;  %1619 = vmatpush.msrb.mxu0 %v4371_v14 }
 0x1a6   :  { %1699 = vmatpush.msra.mxu2 %v4372_v31  ;;  %1670 = vmatpush.msrb.mxu1 %v4362_v7  ;;  %v4388_v31 = vld [vmem:[#allocation55_spill] sm:$0xff] }
 0x1a7   :  { %1774 = vmatpush.msra.mxu3 %v3317_v49  ;;  %1622 = vmatpush.msrb.mxu0 %v4373_v36 }
 0x1a8   :  { %1703 = vmatpush.msra.mxu2 %v4374_v47  ;;  %1672 = vmatpush.msrb.mxu1 %v4364_v51  ;;  %v4381_v47 = vld [vmem:[#allocation33_spill] sm:$0xff] }
 0x1a9   :  { %1776 = vmatpush.msra.mxu3 %v3319_v50  ;;  %1625 = vmatpush.msrb.mxu0 %v4375_v35 }
 0x1aa   :  { %1707 = vmatpush.msra.mxu2 %v4376_v15  ;;  %1674 = vmatpush.msrb.mxu1 %v4366_v55  ;;  %v4382_v15 = vld [vmem:[#allocation37_spill] sm:$0xff] }
 0x1ab   :  { %1778 = vmatpush.msra.mxu3 %v3363_v8  ;;  %1628 = vmatpush.msrb.mxu0 %v4377_v48  ;;  %v4383_v48 = vld [vmem:[#allocation39_spill] sm:$0xff] }
 0x1ac   :  { %1711 = vmatpush.msra.mxu2 %v4378_v13  ;;  %v4384_v13 = vld [vmem:[#allocation41_spill] sm:$0xff] }
 0x1ad   :  { %1780 = vmatpush.msra.mxu3 %v3365_v9  ;;  %1631 = vmatpush.msrb.mxu0 %v4379_v28  ;;  %v4385_v28 = vld [vmem:[#allocation42_spill] sm:$0xff] }
 0x1ae   :  { %1715 = vmatpush.msra.mxu2 %v4380_v53  ;;  %v4386_v53 = vld [vmem:[#allocation48_spill] sm:$0xff] }
 0x1af   :  { %1782 = vmatpush.msra.mxu3 %v4350_v23 }
 0x1b0   :  { %1719 = vmatpush.msra.mxu2 %v4381_v47  ;;  %v4387_v47 = vld [vmem:[#allocation51_spill] sm:$0xff] }
 0x1b1   :  { %1784 = vmatpush.msra.mxu3 %v4353_v56 }
 0x1b2   :  { %1723 = vmatpush.msra.mxu2 %v4382_v15  ;;  %v4389_v15 = vld [vmem:[#allocation58_spill] sm:$0xff] }
 0x1b3   :  { %1786 = vmatpush.msra.mxu3 %v4358_v17  ;;  %v4392_v17 = vld [vmem:[#allocation62_spill] sm:$0xff] }
 0x1b4   :  { %1727 = vmatpush.msra.mxu2 %v4383_v48 }
 0x1b5   :  { %1788 = vmatpush.msra.mxu3 %v4362_v7 }
 0x1b6   :  { %1731 = vmatpush.msra.mxu2 %v4384_v13 }
 0x1b7   :  { %1790 = vmatpush.msra.mxu3 %v4364_v51 }
 0x1b8   :  { %1735 = vmatpush.msra.mxu2 %v4385_v28 }
 0x1b9   :  { %1792 = vmatpush.msra.mxu3 %v4366_v55 }
 0x1ba   :  { %1739 = vmatpush.msra.mxu2 %v4386_v53 }
 0x1bc   :  { %1743 = vmatpush.msra.mxu2 %v4387_v47 }
 0x1be   :  { %1747 = vmatpush.msra.mxu2 %v4388_v31 }
 0x1c0   :  { %1751 = vmatpush.msra.mxu2 %v4389_v15 }
 0x1e3   :  { %v1011_v35 = vpop.f32.mrf.mxu1 }
 0x1eb   :  { %v902_v48 = vpop.f32.mrf.mxu0  ;;  %v1069_v36 = vpop.f32.mrf.mxu2 }
 0x1ec   :  { %v1012_v19 = vadd.f32 %v1011_v35, %v902_v48  ;;  %v1015_v57 = vpop.f32.mrf.mxu1  ;;  %v1809_v35 = vmul.f32 %v4391_v44, %v4391_v44 }
 0x1ed   :  { %v1113_v13 = vpop.f32.mrf.mxu3 }
 0x1ee   :  { %v1070_v14 = vadd.f32 %v1069_v36, %v1012_v19  ;;  %v1824_v29 = vand.u32 4294901760, %v1809_v35  ;;  %v1808_v19 = vmul.f32 %v4392_v17, %v4392_v17 }
 0x1f0   :  { %v1114_v22 = vadd.f32 %v1113_v13, %v1070_v14  ;;  %1825 = vmatpush.msra.mxu0 %v1824_v29  ;;  %v1826_v36 = vand.u32 4294901760, %v1808_v19 }
 0x1f2   :  { %1827 = vmatpush.msra.mxu0 %v1826_v36 }
 0x1f3   :  { %v910_v32 = vpop.f32.mrf.mxu0  ;;  %v1074_v51 = vpop.f32.mrf.mxu2 }
 0x1f4   :  { %v1016_v28 = vadd.f32 %v1015_v57, %v910_v32  ;;  %v1229_v59 = vpop.f32.mrf.mxu1 }
 0x1f5   :  { %v1119_v53 = vpop.f32.mrf.mxu3 }
 0x1f6   :  { %v1075_v55 = vadd.f32 %v1074_v51, %v1016_v28  ;;  %v673_v51 = vmul.f32 0.020408163, %v3726_v40 }
 0x1f8   :  { %v1120_v43 = vadd.f32 %v1119_v53, %v1075_v55  ;;  %v1860_v55 = vsub.f32 %v1809_v35, %v1824_v29  ;;  %v3855_v16 = vmul.f32 %v673_v51, %v673_v51 }
 0x1fb   :  { %v1188_v47 = vpop.f32.mrf.mxu0  ;;  %v1272_v15 = vpop.f32.mrf.mxu2 }
 0x1fc   :  { %v1189_v7 = vadd.f32 %v1188_v47, %v1114_v22  ;;  %v1233_v48 = vpop.f32.mrf.mxu1  ;;  %v2949_v47 = vmul.f32 2.0, %v673_v51 }
 0x1fd   :  { %v1307_v14 = vpop.f32.mrf.mxu3 }
 0x1fe   :  { %v3848_v31 = vadd.f32 %v1229_v59, %v1189_v7  ;;  %v1861_v7 = vand.u32 4294901760, %v1860_v55  ;;  %v1866_v59 = vsub.f32 %v1808_v19, %v1826_v36  ;;  %v1308_v1 = vadd.f32 %v1307_v14, %v1272_v15  ;;  %v4398_v14 = vld [vmem:[#allocation29_spill] sm:$0xff] }
 0x200   :  { %4390 = vst [vmem:[#allocation19_spill] sm:$0xff] %v3848_v31  ;;  %v1862_v44 = vsub.f32 %v1860_v55, %v1861_v7  ;;  %v1867_v28 = vand.u32 4294901760, %v1866_v59 }
 0x202   :  { %v1863_v63 = vand.u32 4294901760, %v1862_v44  ;;  %v1868_v40 = vsub.f32 %v1866_v59, %v1867_v28 }
 0x203   :  { %v1192_v32 = vpop.f32.mrf.mxu0  ;;  %v1333_v53 = vpop.f32.mrf.mxu2 }
 0x204   :  { %v1193_v57 = vadd.f32 %v1192_v32, %v1120_v43  ;;  %v1303_v31 = vpop.f32.mrf.mxu1  ;;  %1864 = vmatpush.msra.mxu1 %v1863_v63  ;;  %v1869_v19 = vand.u32 4294901760, %v1868_v40 }
 0x206   :  { %v1234_v22 = vadd.f32 %v1233_v48, %v1193_v57  ;;  %1870 = vmatpush.msra.mxu1 %v1869_v19  ;;  %v4407_v19 = vld [vmem:[#allocation57_spill] sm:$0xff] }
 0x208   :  { %v1237_v13 = vmul.f32 0.020408163, %v1234_v22  ;;  %v1363_v22 = vpop.f32.mrf.mxu3 }
 0x20a   :  { %v3857_v17 = vmul.f32 %v2949_v47, %v1237_v13  ;;  %v3859_v43 = vmul.f32 %v1237_v13, %v1237_v13  ;;  %v3861_v32 = vmul.f32 %v1237_v13, %v673_v51 }
 0x20b   :  { %v1264_v35 = vpop.f32.mrf.mxu0 }
 0x20c   :  { %4393 = vst [vmem:[#allocation20_spill] sm:$0xff] %v3857_v17  ;;  %v1304_v48 = vadd.f32 %v1303_v31, %v1264_v35  ;;  %v3865_v57 = vadd.f32 %v3859_v43, %v3855_v16  ;;  %v1423_v56 = vpop.f32.mrf.mxu1  ;;  %v1338_v17 = vpop.f32.mrf.mxu2 }
 0x20d   :  { %4394 = vst [vmem:[#allocation25_spill] sm:$0xff] %v3859_v43  ;;  %v1339_v45 = vadd.f32 %v1338_v17, %v1308_v1  ;;  %v4404_v17 = vld [vmem:[#allocation54_spill] sm:$0xff]  ;;  %v4426_v43 = vld [vmem:[#allocation31_spill] sm:$0xff] }
 0x20e   :  { %4395 = vst [vmem:[#allocation26_spill] sm:$0xff] %v3861_v32  ;;  %v1334_v18 = vadd.f32 %v1333_v53, %v1304_v48  ;;  %v4406_v48 = vld [vmem:[#allocation34_spill] sm:$0xff] }
 0x20f   :  { %4396 = vst [vmem:[#allocation61_spill] sm:$0xff] %v3865_v57 }
 0x210   :  { %v1364_v47 = vadd.f32 %v1363_v22, %v1334_v18  ;;  %v1369_v51 = vpop.f32.mrf.mxu3  ;;  %v4409_v22 = vld [vmem:[#allocation59_spill] sm:$0xff] }
 0x211   :  { %v1370_v31 = vadd.f32 %v1369_v51, %v1339_v45  ;;  %v4412_v51 = vld [vmem:[#allocation60_spill] sm:$0xff] }
 0x213   :  { %v1396_v44 = vpop.f32.mrf.mxu0 }
 0x214   :  { %v1397_v0 = vadd.f32 %v1396_v44, %v1364_v47  ;;  %v1427_v35 = vpop.f32.mrf.mxu1  ;;  %v4410_v47 = vld [vmem:[#allocation35_spill] sm:$0xff]  ;;  %v4411_v44 = vld [vmem:[#allocation50_spill] sm:$0xff] }
 0x216   :  { %v1424_v6 = vadd.f32 %v1423_v56, %v1397_v0 }
 0x218   :  { %v1462_v13 = vand.u32 4294901760, %v1424_v6 }
 0x21a   :  { %v1463_v63 = vsub.f32 %v1424_v6, %v1462_v13  ;;  %1576 = vmatmul.f32.vlgmr.msrb.gmra.mxu3 %v1462_v13 }
 0x21b   :  { %v1400_v40 = vpop.f32.mrf.mxu0  ;;  %1988 = vmatpush.msrb.mxu3 %v1824_v29 }
 0x21c   :  { %v1464_v32 = vand.u32 4294901760, %v1463_v63  ;;  %v1401_v57 = vadd.f32 %v1400_v40, %v1370_v31  ;;  %1634 = vmatmul.f32.vlgmr.msrb.gmra.mxu0 %v1463_v63  ;;  %v4414_v31 = vld [vmem:[#allocation53_spill] sm:$0xff] }
 0x21d   :  { %1896 = vmatpush.msrb.mxu0 %v1860_v55  ;;  %1990 = vmatpush.msrb.mxu3 %v1826_v36  ;;  %v4399_v55 = vld [vmem:[#allocation17_spill] sm:$0xff] }
 0x21e   :  { %v1465_v18 = vsub.f32 %v1463_v63, %v1464_v32  ;;  %v1428_v53 = vadd.f32 %v1427_v35, %v1401_v57  ;;  %1678 = vmatmul.f32.vlgmr.msrb.gmra.mxu1 %v1464_v32  ;;  %v4405_v32 = vld [vmem:[#allocation45_spill] sm:$0xff]  ;;  %v4408_v57 = vld [vmem:[#allocation47_spill] sm:$0xff]  ;;  %v4415_v63 = vld [vmem:[#allocation40_spill] sm:$0xff] }
 0x21f   :  { %1926 = vmatpush.msrb.mxu1 %v1824_v29  ;;  %1899 = vmatpush.msrb.mxu0 %v1866_v59  ;;  %v4397_v29 = vld [vmem:[#allocation43_spill] sm:$0xff]  ;;  %v4402_v59 = vld [vmem:[#allocation18_spill] sm:$0xff]  ;;  %v4416_v40 = vld [vmem:[#allocation21_spill] sm:$0xff] }
 0x220   :  { %v1470_v1 = vand.u32 4294901760, %v1428_v53  ;;  %v1466_v0 = vand.u32 4294901760, %v1465_v18  ;;  %v4417_v35 = vld [vmem:[#allocation46_spill] sm:$0xff] }
 0x221   :  { %1928 = vmatpush.msrb.mxu1 %v1826_v36  ;;  %v4400_v36 = vld [vmem:[#allocation44_spill] sm:$0xff]  ;;  %v4418_v18 = vld [vmem:[#allocation22_spill] sm:$0xff] }
 0x222   :  { %v1471_v56 = vsub.f32 %v1428_v53, %v1470_v1  ;;  %1467 = vmatmul.f32.vlgmr.msrb.gmra.mxu2 %v1466_v0  ;;  %1580 = vmatmul.f32.gmra.mxu3 %v1470_v1  ;;  %v4419_v53 = vld [vmem:[#allocation49_spill] sm:$0xff]  ;;  %v4421_v0 = vld [vmem:[#allocation52_spill] sm:$0xff] }
 0x223   :  { %1959 = vmatpush.msrb.mxu2 %v1861_v7  ;;  %v4401_v7 = vld [vmem:[#allocation36_spill] sm:$0xff] }
 0x224   :  { %1639 = vmatmul.f32.gmra.mxu0 %v1471_v56  ;;  %v1472_v6 = vand.u32 4294901760, %v1471_v56 }
 0x225   :  { %1963 = vmatpush.msrb.mxu2 %v1867_v28  ;;  %v4403_v28 = vld [vmem:[#allocation30_spill] sm:$0xff] }
 0x226   :  { %1684 = vmatmul.f32.gmra.mxu1 %v1472_v6  ;;  %v1473_v45 = vsub.f32 %v1471_v56, %v1472_v6  ;;  %v4422_v56 = vld [vmem:[#allocation24_spill] sm:$0xff] }
 0x227   :  { %v4423_v6 = vld [vmem:[#allocation56_spill] sm:$0xff] }
 0x228   :  { %v1474_v15 = vand.u32 4294901760, %v1473_v45  ;;  %v4424_v45 = vld [vmem:[#allocation27_spill] sm:$0xff] }
 0x22a   :  { %1475 = vmatmul.f32.gmra.mxu2 %v1474_v15  ;;  %1794 = vmatmul.f32.vlgmr.msra.gmra.mxu3 %v1462_v13  ;;  %v4425_v15 = vld [vmem:[#allocation28_spill] sm:$0xff] }
 0x22b   :  { %2214 = vmatpush.msra.mxu3 %v3265_v24 }
 0x22c   :  { %1833 = vmatmul.f32.vlgmr.msra.gmra.mxu0 %v3289_v39 }
 0x22d   :  { %2001 = vmatpush.msra.mxu0 %v3265_v24  ;;  %2216 = vmatpush.msra.mxu3 %v3267_v25 }
 0x22e   :  { %1872 = vmatmul.f32.vlgmr.msra.gmra.mxu1 %v3246_v10 }
 0x22f   :  { %2054 = vmatpush.msra.mxu1 %v3342_v61  ;;  %2003 = vmatpush.msra.mxu0 %v3267_v25 }
 0x230   :  { %2218 = vmatpush.msra.mxu3 %v3269_v26 }
 0x231   :  { %2060 = vmatpush.msra.mxu1 %v3344_v62  ;;  %2005 = vmatpush.msra.mxu0 %v3269_v26 }
 0x232   :  { %1753 = vmatmul.f32.vlgmr.msra.gmra.mxu2 %v1462_v13  ;;  %1798 = vmatmul.f32.gmra.mxu3 %v1470_v1  ;;  %v4413_v13 = vld [vmem:[#allocation38_spill] sm:$0xff] }
 0x233   :  { %2066 = vmatpush.msra.mxu1 %v3354_v3  ;;  %2007 = vmatpush.msra.mxu0 %v3271_v27 }
 0x234   :  { %1841 = vmatmul.f32.gmra.mxu0 %v3350_v2  ;;  %2156 = vmatpush.msra.mxu2 %v3277_v33 }
 0x235   :  { %2072 = vmatpush.msra.mxu1 %v3369_v4  ;;  %2009 = vmatpush.msra.mxu0 %v3293_v41 }
 0x236   :  { %1876 = vmatmul.f32.gmra.mxu1 %v3248_v11  ;;  %2159 = vmatpush.msra.mxu2 %v3280_v34 }
 0x237   :  { %2078 = vmatpush.msra.mxu1 %v3392_v21  ;;  %2011 = vmatpush.msra.mxu0 %v3295_v42 }
 0x238   :  { %2162 = vmatpush.msra.mxu2 %v4351_v5  ;;  %2220 = vmatpush.msra.mxu3 %v3271_v27 }
 0x239   :  { %2084 = vmatpush.msra.mxu1 %v3405_v30  ;;  %2013 = vmatpush.msra.mxu0 %v3317_v49 }
 0x23a   :  { %1757 = vmatmul.f32.gmra.mxu2 %v1470_v1  ;;  %1992 = vmatmul.f32.vlgmr.msrb.gmra.mxu3 %v3246_v10  ;;  %v4420_v1 = vld [vmem:[#allocation23_spill] sm:$0xff] }
 0x23b   :  { %2090 = vmatpush.msra.mxu1 %v3419_v38  ;;  %2015 = vmatpush.msra.mxu0 %v3319_v50 }
 0x23c   :  { %1902 = vmatmul.f32.vlgmr.msrb.gmra.mxu0 %v3251_v12  ;;  %2165 = vmatpush.msra.mxu2 %v4354_v46 }
 0x23d   :  { %2096 = vmatpush.msra.mxu1 %v3430_v52  ;;  %2017 = vmatpush.msra.mxu0 %v3363_v8 }
 0x23e   :  { %1932 = vmatmul.f32.vlgmr.msrb.gmra.mxu1 %v3259_v20  ;;  %2168 = vmatpush.msra.mxu2 %v4356_v37 }
 0x23f   :  { %2102 = vmatpush.msra.mxu1 %v3442_v58  ;;  %2019 = vmatpush.msra.mxu0 %v3365_v9 }
 0x240   :  { %2171 = vmatpush.msra.mxu2 %v4359_v54  ;;  %2222 = vmatpush.msra.mxu3 %v3293_v41 }
 0x241   :  { %2108 = vmatpush.msra.mxu1 %v3449_v60  ;;  %2021 = vmatpush.msra.mxu0 %v4350_v23 }
 0x242   :  { %1965 = vmatmul.f32.vlgmr.msrb.gmra.mxu2 %v3246_v10  ;;  %1996 = vmatmul.f32.gmra.mxu3 %v3248_v11 }
 0x243   :  { %2114 = vmatpush.msra.mxu1 %v4397_v29  ;;  %2174 = vmatpush.msra.mxu2 %v4398_v14 }
 0x244   :  { %1907 = vmatmul.f32.gmra.mxu0 %v4399_v55  ;;  %2224 = vmatpush.msra.mxu3 %v3295_v42 }
 0x245   :  { %2120 = vmatpush.msra.mxu1 %v4400_v36  ;;  %2023 = vmatpush.msra.mxu0 %v4401_v7 }
 0x246   :  { %1938 = vmatmul.f32.gmra.mxu1 %v4402_v59  ;;  %2177 = vmatpush.msra.mxu2 %v4403_v28  ;;  %v3044_v28 = vld [vmem:[#allocation7] sm:$0xff]  ;;  %v3045_v59 = vld [vmem:[#allocation8] sm:$0xff] }
 0x247   :  { %2126 = vmatpush.msra.mxu1 %v4404_v17  ;;  %2226 = vmatpush.msra.mxu3 %v3317_v49 }
 0x248   :  { %2025 = vmatpush.msra.mxu0 %v4405_v32  ;;  %2180 = vmatpush.msra.mxu2 %v4406_v48 }
 0x249   :  { %2132 = vmatpush.msra.mxu1 %v4407_v19  ;;  %2228 = vmatpush.msra.mxu3 %v3319_v50 }
 0x24a   :  { %1969 = vmatmul.f32.gmra.mxu2 %v3248_v11  ;;  %2027 = vmatpush.msra.mxu0 %v4408_v57 }
 0x24b   :  { %2138 = vmatpush.msra.mxu1 %v4409_v22  ;;  %2183 = vmatpush.msra.mxu2 %v4410_v47 }
 0x24c   :  { %2230 = vmatpush.msra.mxu3 %v3363_v8  ;;  %2029 = vmatpush.msra.mxu0 %v4411_v44 }
 0x24d   :  { %2144 = vmatpush.msra.mxu1 %v4412_v51  ;;  %2186 = vmatpush.msra.mxu2 %v4413_v13 }
 0x24e   :  { %2232 = vmatpush.msra.mxu3 %v3365_v9  ;;  %2031 = vmatpush.msra.mxu0 %v4414_v31 }
 0x24f   :  { %2332 = vmatpush.msrb.mxu1 %v3265_v24  ;;  %2189 = vmatpush.msra.mxu2 %v4415_v63 }
 0x250   :  { %2234 = vmatpush.msra.mxu3 %v4350_v23  ;;  %2261 = vmatpush.msrb.mxu0 %v4416_v40 }
 0x251   :  { %2334 = vmatpush.msrb.mxu1 %v3267_v25  ;;  %2192 = vmatpush.msra.mxu2 %v4417_v35 }
 0x252   :  { %2236 = vmatpush.msra.mxu3 %v4401_v7  ;;  %2265 = vmatpush.msrb.mxu0 %v4418_v18 }
 0x253   :  { %2336 = vmatpush.msrb.mxu1 %v3269_v26  ;;  %2195 = vmatpush.msra.mxu2 %v4419_v53 }
 0x254   :  { %2238 = vmatpush.msra.mxu3 %v4405_v32  ;;  %2269 = vmatpush.msrb.mxu0 %v4420_v1 }
 0x255   :  { %2338 = vmatpush.msrb.mxu1 %v3271_v27  ;;  %2198 = vmatpush.msra.mxu2 %v4421_v0  ;;  %v4430_v0 = vld [vmem:[#allocation41_spill] sm:$0xff] }
 0x256   :  { %2240 = vmatpush.msra.mxu3 %v4408_v57  ;;  %2273 = vmatpush.msrb.mxu0 %v4422_v56  ;;  %v4427_v56 = vld [vmem:[#allocation33_spill] sm:$0xff] }
 0x257   :  { %2340 = vmatpush.msrb.mxu1 %v3293_v41  ;;  %2201 = vmatpush.msra.mxu2 %v4423_v6  ;;  %v4428_v6 = vld [vmem:[#allocation37_spill] sm:$0xff] }
 0x258   :  { %2242 = vmatpush.msra.mxu3 %v4411_v44  ;;  %2277 = vmatpush.msrb.mxu0 %v4424_v45  ;;  %v4429_v45 = vld [vmem:[#allocation39_spill] sm:$0xff] }
 0x259   :  { %2342 = vmatpush.msrb.mxu1 %v3295_v42 }
 0x25a   :  { %2244 = vmatpush.msra.mxu3 %v4414_v31  ;;  %2281 = vmatpush.msrb.mxu0 %v4425_v15  ;;  %v4431_v15 = vld [vmem:[#allocation42_spill] sm:$0xff] }
 0x25b   :  { %2344 = vmatpush.msrb.mxu1 %v3317_v49 }
 0x25c   :  { %2285 = vmatpush.msrb.mxu0 %v4426_v43  ;;  %v4432_v43 = vld [vmem:[#allocation48_spill] sm:$0xff] }
 0x25d   :  { %2346 = vmatpush.msrb.mxu1 %v3319_v50 }
 0x25e   :  { %2289 = vmatpush.msrb.mxu0 %v4427_v56  ;;  %v4433_v56 = vld [vmem:[#allocation51_spill] sm:$0xff] }
 0x25f   :  { %2348 = vmatpush.msrb.mxu1 %v3363_v8 }
 0x260   :  { %2293 = vmatpush.msrb.mxu0 %v4428_v6  ;;  %v4434_v6 = vld [vmem:[#allocation55_spill] sm:$0xff] }
 0x261   :  { %2350 = vmatpush.msrb.mxu1 %v3365_v9 }
 0x262   :  { %2297 = vmatpush.msrb.mxu0 %v4429_v45  ;;  %v4435_v45 = vld [vmem:[#allocation58_spill] sm:$0xff] }
 0x263   :  { %2352 = vmatpush.msrb.mxu1 %v4350_v23 }
 0x264   :  { %2301 = vmatpush.msrb.mxu0 %v4430_v0 }
 0x265   :  { %2354 = vmatpush.msrb.mxu1 %v4401_v7 }
 0x266   :  { %2305 = vmatpush.msrb.mxu0 %v4431_v15 }
 0x267   :  { %2356 = vmatpush.msrb.mxu1 %v4405_v32 }
 0x268   :  { %2309 = vmatpush.msrb.mxu0 %v4432_v43 }
 0x269   :  { %2358 = vmatpush.msrb.mxu1 %v4408_v57  ;;  %v3043_v57 = vld [vmem:[#allocation8 + $0x8] sm:$0xff] }
 0x26a   :  { %2313 = vmatpush.msrb.mxu0 %v4433_v56 }
 0x26b   :  { %2360 = vmatpush.msrb.mxu1 %v4411_v44 }
 0x26c   :  { %2317 = vmatpush.msrb.mxu0 %v4434_v6 }
 0x26d   :  { %2362 = vmatpush.msrb.mxu1 %v4414_v31  ;;  %v3042_v31 = vld [vmem:[#allocation7 + $0x8] sm:$0xff] }
 0x26e   :  { %2321 = vmatpush.msrb.mxu0 %v4435_v45  ;;  %v2379_v6 = vmul.f32 %v3043_v57, %v3042_v31 }
 0x270   :  { %v2394_v32 = vand.u32 4294901760, %v2379_v6 }
 0x272   :  { %2395 = vmatpush.msrb.mxu2 %v2394_v32  ;;  %v2430_v17 = vsub.f32 %v2379_v6, %v2394_v32 }
 0x299   :  { %v1635_v1 = vpop.f32.mrf.mxu0 }
 0x29b   :  { %v1679_v0 = vpop.f32.mrf.mxu1 }
 0x29d   :  { %v1577_v53 = vpop.f32.mrf.mxu3 }
 0x2a1   :  { %v1640_v18 = vpop.f32.mrf.mxu0 }
 0x2a3   :  { %v1685_v35 = vpop.f32.mrf.mxu1 }
 0x2a5   :  { %v1468_v15 = vpop.f32.mrf.mxu2  ;;  %v1581_v63 = vpop.f32.mrf.mxu3 }
 0x2a6   :  { %v1578_v40 = vadd.f32 %v1577_v53, %v1468_v15  ;;  %v2378_v53 = vmul.f32 %v3045_v59, %v3044_v28 }
 0x2a8   :  { %v1636_v13 = vadd.f32 %v1635_v1, %v1578_v40 }
 0x2a9   :  { %v1834_v43 = vpop.f32.mrf.mxu0 }
 0x2aa   :  { %v1680_v51 = vadd.f32 %v1679_v0, %v1636_v13  ;;  %v2431_v13 = vand.u32 4294901760, %v2430_v17  ;;  %v2396_v0 = vand.u32 4294901760, %v2378_v53 }
 0x2ab   :  { %v1873_v44 = vpop.f32.mrf.mxu1 }
 0x2ac   :  { %2397 = vmatpush.msrb.mxu2 %v2396_v0  ;;  %v1874_v6 = vadd.f32 %v1873_v44, %v1834_v43 }
 0x2ad   :  { %v1476_v47 = vpop.f32.mrf.mxu2  ;;  %v1795_v19 = vpop.f32.mrf.mxu3 }
 0x2ae   :  { %v1582_v56 = vadd.f32 %v1581_v63, %v1476_v47  ;;  %v2432_v47 = vsub.f32 %v2430_v17, %v2431_v13  ;;  %v2436_v63 = vsub.f32 %v2378_v53, %v2396_v0 }
 0x2b0   :  { %v1641_v22 = vadd.f32 %v1640_v18, %v1582_v56  ;;  %v2433_v57 = vand.u32 4294901760, %v2432_v47  ;;  %v2437_v31 = vand.u32 4294901760, %v2436_v63 }
 0x2b1   :  { %v1842_v45 = vpop.f32.mrf.mxu0 }
 0x2b2   :  { %v1686_v48 = vadd.f32 %v1685_v35, %v1641_v22  ;;  %2434 = vmatpush.msrb.mxu3 %v2433_v57  ;;  %v2438_v35 = vsub.f32 %v2436_v63, %v2437_v31 }
 0x2b3   :  { %v1877_v15 = vpop.f32.mrf.mxu1 }
 0x2b4   :  { %v2439_v59 = vand.u32 4294901760, %v2438_v35  ;;  %v1878_v14 = vadd.f32 %v1877_v15, %v1842_v45 }
 0x2b5   :  { %v1754_v40 = vpop.f32.mrf.mxu2  ;;  %v1799_v18 = vpop.f32.mrf.mxu3 }
 0x2b6   :  { %v1755_v1 = vadd.f32 %v1754_v40, %v1680_v51  ;;  %2440 = vmatpush.msrb.mxu3 %v2439_v59  ;;  %v4475_v59 = vld [vmem:[#allocation55_spill] sm:$0xff] }
 0x2b8   :  { %v3975_v7 = vadd.f32 %v1795_v19, %v1755_v1 }
 0x2b9   :  { %v1903_v22 = vpop.f32.mrf.mxu0 }
 0x2ba   :  { %4436 = vst [vmem:[#allocation62_spill] sm:$0xff] %v3975_v7  ;;  %v1904_v55 = vadd.f32 %v1903_v22, %v1874_v6 }
 0x2bb   :  { %v1933_v28 = vpop.f32.mrf.mxu1 }
 0x2bc   :  { %v1934_v1 = vadd.f32 %v1933_v28, %v1904_v55  ;;  %v4476_v28 = vld [vmem:[#allocation58_spill] sm:$0xff] }
 0x2bd   :  { %v1758_v56 = vpop.f32.mrf.mxu2  ;;  %v1993_v19 = vpop.f32.mrf.mxu3 }
 0x2be   :  { %v1759_v36 = vadd.f32 %v1758_v56, %v1686_v48 }
 0x2c0   :  { %v1800_v51 = vadd.f32 %v1799_v18, %v1759_v36 }
 0x2c1   :  { %v1908_v47 = vpop.f32.mrf.mxu0 }
 0x2c2   :  { %v3977_v40 = vmul.f32 0.020408163, %v1800_v51  ;;  %v1909_v29 = vadd.f32 %v1908_v47, %v1878_v14 }
 0x2c3   :  { %v1939_v43 = vpop.f32.mrf.mxu1 }
 0x2c4   :  { %v1807_v53 = vsub.f32 %v3977_v40, %v3855_v16  ;;  %v1940_v44 = vadd.f32 %v1939_v43, %v1909_v29 }
 0x2c5   :  { %v1966_v7 = vpop.f32.mrf.mxu2  ;;  %v1997_v18 = vpop.f32.mrf.mxu3 }
 0x2c6   :  { %v1967_v57 = vadd.f32 %v1966_v7, %v1934_v1  ;;  %v4478_v1 = vld [vmem:[#allocation65_spill] sm:$0xff] }
 0x2c8   :  { %v1994_v23 = vadd.f32 %v1993_v19, %v1967_v57  ;;  %v4477_v19 = vld [vmem:[#allocation66_spill] sm:$0xff] }
 0x2c9   :  { %v448_v47 = vadd.f32 %v4478_v1, %v4477_v19 }
 0x2ca   :  { %v2032_v48 = vand.u32 4294901760, %v1994_v23 }
 0x2cc   :  { %v2033_v35 = vsub.f32 %v1994_v23, %v2032_v48  ;;  %2146 = vmatmul.f32.vlgmr.msra.gmra.mxu1 %v2032_v48 }
 0x2cd   :  { %v1970_v36 = vpop.f32.mrf.mxu2  ;;  %2558 = vmatpush.msra.mxu1 %v2394_v32 }
 0x2ce   :  { %v2034_v22 = vand.u32 4294901760, %v2033_v35  ;;  %v1971_v56 = vadd.f32 %v1970_v36, %v1940_v44  ;;  %2204 = vmatmul.f32.vlgmr.msra.gmra.mxu2 %v2033_v35 }
 0x2cf   :  { %2466 = vmatpush.msra.mxu2 %v2430_v17  ;;  %2560 = vmatpush.msra.mxu1 %v2396_v0  ;;  %v4459_v17 = vld [vmem:[#allocation22_spill] sm:$0xff] }
 0x2d0   :  { %v2035_v55 = vsub.f32 %v2033_v35, %v2034_v22  ;;  %v1998_v6 = vadd.f32 %v1997_v18, %v1971_v56  ;;  %2248 = vmatmul.f32.vlgmr.msra.gmra.mxu3 %v2034_v22  ;;  %v4479_v35 = vld [vmem:[#allocation63_spill] sm:$0xff] }
 0x2d1   :  { %2496 = vmatpush.msra.mxu3 %v2394_v32  ;;  %2469 = vmatpush.msra.mxu2 %v2436_v63  ;;  %v4461_v32 = vld [vmem:[#allocation23_spill] sm:$0xff]  ;;  %v4468_v63 = vld [vmem:[#allocation33_spill] sm:$0xff]  ;;  %v506_v36 = vadd.f32 %v4479_v35, %v448_v47 }
 0x2d2   :  { %v2040_v14 = vand.u32 4294901760, %v1998_v6  ;;  %v2036_v7 = vand.u32 4294901760, %v2035_v55  ;;  %v4480_v55 = vld [vmem:[#allocation64_spill] sm:$0xff] }
 0x2d3   :  { %2498 = vmatpush.msra.mxu3 %v2396_v0  ;;  %v4465_v0 = vld [vmem:[#allocation27_spill] sm:$0xff] }
 0x2d4   :  { %v2041_v45 = vsub.f32 %v1998_v6, %v2040_v14  ;;  %2037 = vmatmul.f32.vlgmr.msra.gmra.mxu0 %v2036_v7  ;;  %2150 = vmatmul.f32.gmra.mxu1 %v2040_v14  ;;  %v550_v6 = vadd.f32 %v4480_v55, %v506_v36  ;;  %v4481_v7 = vld [vmem:[#allocation16_spill] sm:$0xff] }
 0x2d5   :  { %2529 = vmatpush.msra.mxu0 %v2431_v13  ;;  %v4463_v13 = vld [vmem:[#allocation24_spill] sm:$0xff] }
 0x2d6   :  { %2209 = vmatmul.f32.gmra.mxu2 %v2041_v45  ;;  %v2042_v23 = vand.u32 4294901760, %v2041_v45 }
 0x2d7   :  { %2533 = vmatpush.msra.mxu0 %v2437_v31  ;;  %v4470_v31 = vld [vmem:[#allocation39_spill] sm:$0xff] }
 0x2d8   :  { %v2043_v29 = vsub.f32 %v2041_v45, %v2042_v23  ;;  %2254 = vmatmul.f32.gmra.mxu3 %v2042_v23  ;;  %v625_v45 = vadd.f32 %v4481_v7, %v550_v6 }
 0x2da   :  { %v2044_v15 = vand.u32 4294901760, %v2043_v29 }
 0x2dc   :  { %2045 = vmatmul.f32.gmra.mxu0 %v2044_v15  ;;  %2364 = vmatmul.f32.vlgmr.msrb.gmra.mxu1 %v2032_v48 }
 0x2dd   :  { %2784 = vmatpush.msrb.mxu1 %v3265_v24 }
 0x2de   :  { %2403 = vmatmul.f32.vlgmr.msrb.gmra.mxu2 %v3289_v39  ;;  %v4441_v39 = vld [vmem:[#allocation44_spill] sm:$0xff] }
 0x2df   :  { %2571 = vmatpush.msrb.mxu2 %v3265_v24  ;;  %2786 = vmatpush.msrb.mxu1 %v3267_v25 }
 0x2e0   :  { %2442 = vmatmul.f32.vlgmr.msrb.gmra.mxu3 %v3246_v10 }
 0x2e1   :  { %2624 = vmatpush.msrb.mxu3 %v3342_v61  ;;  %2573 = vmatpush.msrb.mxu2 %v3267_v25  ;;  %v4442_v61 = vld [vmem:[#allocation36_spill] sm:$0xff] }
 0x2e2   :  { %2788 = vmatpush.msrb.mxu1 %v3269_v26 }
 0x2e3   :  { %2630 = vmatpush.msrb.mxu3 %v3344_v62  ;;  %2575 = vmatpush.msrb.mxu2 %v3269_v26  ;;  %v4443_v62 = vld [vmem:[#allocation18_spill] sm:$0xff] }
 0x2e4   :  { %2323 = vmatmul.f32.vlgmr.msrb.gmra.mxu0 %v2032_v48  ;;  %2368 = vmatmul.f32.gmra.mxu1 %v2040_v14 }
 0x2e5   :  { %2636 = vmatpush.msrb.mxu3 %v3354_v3  ;;  %2577 = vmatpush.msrb.mxu2 %v3271_v27  ;;  %v4445_v3 = vld [vmem:[#allocation54_spill] sm:$0xff] }
 0x2e6   :  { %2411 = vmatmul.f32.gmra.mxu2 %v3350_v2  ;;  %2726 = vmatpush.msrb.mxu0 %v3277_v33  ;;  %v4438_v33 = vld [vmem:[#allocation43_spill] sm:$0xff]  ;;  %v4444_v2 = vld [vmem:[#allocation30_spill] sm:$0xff] }
 0x2e7   :  { %2642 = vmatpush.msrb.mxu3 %v3369_v4  ;;  %2579 = vmatpush.msrb.mxu2 %v3293_v41  ;;  %v4447_v4 = vld [vmem:[#allocation34_spill] sm:$0xff] }
 0x2e8   :  { %2446 = vmatmul.f32.gmra.mxu3 %v3248_v11  ;;  %2729 = vmatpush.msrb.mxu0 %v3280_v34  ;;  %v4440_v34 = vld [vmem:[#allocation17_spill] sm:$0xff] }
 0x2e9   :  { %2648 = vmatpush.msrb.mxu3 %v3392_v21  ;;  %2581 = vmatpush.msrb.mxu2 %v3295_v42  ;;  %v4448_v21 = vld [vmem:[#allocation57_spill] sm:$0xff] }
 0x2ea   :  { %2732 = vmatpush.msrb.mxu0 %v4351_v5  ;;  %2790 = vmatpush.msrb.mxu1 %v3271_v27  ;;  %v4454_v5 = vld [vmem:[#allocation38_spill] sm:$0xff] }
 0x2eb   :  { %2654 = vmatpush.msrb.mxu3 %v3405_v30  ;;  %2583 = vmatpush.msrb.mxu2 %v3317_v49  ;;  %v4449_v30 = vld [vmem:[#allocation47_spill] sm:$0xff] }
 0x2ec   :  { %2327 = vmatmul.f32.gmra.mxu0 %v2040_v14  ;;  %2562 = vmatmul.f32.vlgmr.msra.gmra.mxu1 %v3246_v10 }
 0x2ed   :  { %2660 = vmatpush.msrb.mxu3 %v3419_v38  ;;  %2585 = vmatpush.msrb.mxu2 %v3319_v50  ;;  %v4450_v38 = vld [vmem:[#allocation59_spill] sm:$0xff] }
 0x2ee   :  { %2472 = vmatmul.f32.vlgmr.msra.gmra.mxu2 %v3251_v12  ;;  %2735 = vmatpush.msrb.mxu0 %v4354_v46  ;;  %v4437_v12 = vld [vmem:[#allocation32_spill] sm:$0xff]  ;;  %v4455_v46 = vld [vmem:[#allocation53_spill] sm:$0xff] }
 0x2ef   :  { %2666 = vmatpush.msrb.mxu3 %v3430_v52  ;;  %2587 = vmatpush.msrb.mxu2 %v3363_v8  ;;  %v4451_v52 = vld [vmem:[#allocation35_spill] sm:$0xff] }
 0x2f0   :  { %2502 = vmatmul.f32.vlgmr.msra.gmra.mxu3 %v3259_v20  ;;  %2738 = vmatpush.msrb.mxu0 %v4356_v37  ;;  %v4439_v20 = vld [vmem:[#allocation29_spill] sm:$0xff] }
 0x2f1   :  { %2672 = vmatpush.msrb.mxu3 %v3442_v58  ;;  %2589 = vmatpush.msrb.mxu2 %v3365_v9  ;;  %v4452_v58 = vld [vmem:[#allocation50_spill] sm:$0xff]  ;;  %v4457_v37 = vld [vmem:[#allocation21_spill] sm:$0xff] }
 0x2f2   :  { %2741 = vmatpush.msrb.mxu0 %v4359_v54  ;;  %2792 = vmatpush.msrb.mxu1 %v3293_v41  ;;  %v4458_v54 = vld [vmem:[#allocation46_spill] sm:$0xff] }
 0x2f3   :  { %2678 = vmatpush.msrb.mxu3 %v3449_v60  ;;  %2591 = vmatpush.msrb.mxu2 %v4437_v12  ;;  %v4453_v60 = vld [vmem:[#allocation60_spill] sm:$0xff] }
 0x2f4   :  { %2535 = vmatmul.f32.vlgmr.msra.gmra.mxu0 %v3246_v10  ;;  %2566 = vmatmul.f32.gmra.mxu1 %v3248_v11  ;;  %v4446_v10 = vld [vmem:[#allocation45_spill] sm:$0xff] }
 0x2f5   :  { %2684 = vmatpush.msrb.mxu3 %v4438_v33  ;;  %2744 = vmatpush.msrb.mxu0 %v4439_v20  ;;  %v4482_v33 = vld [vmem:[#allocation15_spill] sm:$0xff] }
 0x2f6   :  { %2477 = vmatmul.f32.gmra.mxu2 %v4440_v34  ;;  %2794 = vmatpush.msrb.mxu1 %v3295_v42  ;;  %v666_v20 = vadd.f32 %v4482_v33, %v625_v45 }
 0x2f7   :  { %2690 = vmatpush.msrb.mxu3 %v4441_v39  ;;  %2593 = vmatpush.msrb.mxu2 %v4442_v61  ;;  %v4483_v39 = vld [vmem:[#allocation19_spill] sm:$0xff] }
 0x2f8   :  { %2508 = vmatmul.f32.gmra.mxu3 %v4443_v62  ;;  %2747 = vmatpush.msrb.mxu0 %v4444_v2 }
 0x2f9   :  { %2696 = vmatpush.msrb.mxu3 %v4445_v3  ;;  %2796 = vmatpush.msrb.mxu1 %v3317_v49  ;;  %v4098_v3 = vmul.f32 0.020408163, %v666_v20 }
 0x2fa   :  { %2595 = vmatpush.msrb.mxu2 %v4446_v10  ;;  %2750 = vmatpush.msrb.mxu0 %v4447_v4 }
 0x2fb   :  { %2702 = vmatpush.msrb.mxu3 %v4448_v21  ;;  %2798 = vmatpush.msrb.mxu1 %v3319_v50 }
 0x2fc   :  { %2539 = vmatmul.f32.gmra.mxu0 %v3248_v11  ;;  %2597 = vmatpush.msrb.mxu2 %v4449_v30  ;;  %v4456_v11 = vld [vmem:[#allocation40_spill] sm:$0xff] }
 0x2fd   :  { %2708 = vmatpush.msrb.mxu3 %v4450_v38  ;;  %2753 = vmatpush.msrb.mxu0 %v4451_v52 }
 0x2fe   :  { %2800 = vmatpush.msrb.mxu1 %v3363_v8  ;;  %2599 = vmatpush.msrb.mxu2 %v4452_v58 }
 0x2ff   :  { %2714 = vmatpush.msrb.mxu3 %v4453_v60  ;;  %2756 = vmatpush.msrb.mxu0 %v4454_v5  ;;  %v1804_v60 = vmul.f32 %v4098_v3, %v4098_v3 }
 0x300   :  { %2802 = vmatpush.msrb.mxu1 %v3365_v9  ;;  %2601 = vmatpush.msrb.mxu2 %v4455_v46 }
 0x301   :  { %2902 = vmatpush.msra.mxu3 %v3265_v24  ;;  %2759 = vmatpush.msrb.mxu0 %v4456_v11  ;;  %v4460_v24 = vld [vmem:[#allocation49_spill] sm:$0xff] }
 0x302   :  { %2804 = vmatpush.msrb.mxu1 %v4437_v12  ;;  %2831 = vmatpush.msra.mxu2 %v4457_v37 }
 0x303   :  { %2904 = vmatpush.msra.mxu3 %v3267_v25  ;;  %2762 = vmatpush.msrb.mxu0 %v4458_v54  ;;  %v4462_v25 = vld [vmem:[#allocation52_spill] sm:$0xff] }
 0x304   :  { %2806 = vmatpush.msrb.mxu1 %v4442_v61  ;;  %2835 = vmatpush.msra.mxu2 %v4459_v17 }
 0x305   :  { %2906 = vmatpush.msra.mxu3 %v3269_v26  ;;  %2765 = vmatpush.msrb.mxu0 %v4460_v24  ;;  %v4464_v26 = vld [vmem:[#allocation56_spill] sm:$0xff] }
 0x306   :  { %2808 = vmatpush.msrb.mxu1 %v4446_v10  ;;  %2839 = vmatpush.msra.mxu2 %v4461_v32 }
 0x307   :  { %2908 = vmatpush.msra.mxu3 %v3271_v27  ;;  %2768 = vmatpush.msrb.mxu0 %v4462_v25  ;;  %v4466_v27 = vld [vmem:[#allocation28_spill] sm:$0xff] }
 0x308   :  { %2810 = vmatpush.msrb.mxu1 %v4449_v30  ;;  %2843 = vmatpush.msra.mxu2 %v4463_v13 }
 0x309   :  { %2910 = vmatpush.msra.mxu3 %v3293_v41  ;;  %2771 = vmatpush.msrb.mxu0 %v4464_v26  ;;  %v4467_v41 = vld [vmem:[#allocation31_spill] sm:$0xff] }
 0x30a   :  { %2812 = vmatpush.msrb.mxu1 %v4452_v58  ;;  %2847 = vmatpush.msra.mxu2 %v4465_v0 }
 0x30b   :  { %2912 = vmatpush.msra.mxu3 %v3295_v42  ;;  %v4469_v42 = vld [vmem:[#allocation37_spill] sm:$0xff] }
 0x30c   :  { %2814 = vmatpush.msrb.mxu1 %v4455_v46  ;;  %2851 = vmatpush.msra.mxu2 %v4466_v27 }
 0x30d   :  { %2914 = vmatpush.msra.mxu3 %v3317_v49  ;;  %v4471_v49 = vld [vmem:[#allocation41_spill] sm:$0xff] }
 0x30e   :  { %2855 = vmatpush.msra.mxu2 %v4467_v41 }
 0x30f   :  { %2916 = vmatpush.msra.mxu3 %v3319_v50  ;;  %v4472_v50 = vld [vmem:[#allocation42_spill] sm:$0xff] }
 0x310   :  { %2859 = vmatpush.msra.mxu2 %v4468_v63 }
 0x311   :  { %2918 = vmatpush.msra.mxu3 %v3363_v8  ;;  %v4473_v8 = vld [vmem:[#allocation48_spill] sm:$0xff] }
 0x312   :  { %2863 = vmatpush.msra.mxu2 %v4469_v42  ;;  %v4485_v42 = vld [vmem:[#allocation25_spill] sm:$0xff] }
 0x313   :  { %2920 = vmatpush.msra.mxu3 %v3365_v9  ;;  %v4474_v9 = vld [vmem:[#allocation51_spill] sm:$0xff] }
 0x314   :  { %2867 = vmatpush.msra.mxu2 %v4470_v31 }
 0x315   :  { %2922 = vmatpush.msra.mxu3 %v4437_v12 }
 0x316   :  { %2871 = vmatpush.msra.mxu2 %v4471_v49 }
 0x317   :  { %2924 = vmatpush.msra.mxu3 %v4442_v61  ;;  %v4096_v61 = vmul.f32 0.020408163, %v4483_v39 }
 0x318   :  { %2875 = vmatpush.msra.mxu2 %v4472_v50 }
 0x319   :  { %2926 = vmatpush.msra.mxu3 %v4446_v10 }
 0x31a   :  { %2879 = vmatpush.msra.mxu2 %v4473_v8 }
 0x31b   :  { %2928 = vmatpush.msra.mxu3 %v4449_v30  ;;  %v4484_v30 = vld [vmem:[#allocation62_spill] sm:$0xff] }
 0x31c   :  { %2883 = vmatpush.msra.mxu2 %v4474_v9  ;;  %v1802_v38 = vmul.f32 0.020408163, %v4484_v30 }
 0x31d   :  { %2930 = vmatpush.msra.mxu3 %v4452_v58  ;;  %v2374_v58 = vmul.f32 %v4096_v61, %v4096_v61 }
 0x31e   :  { %2887 = vmatpush.msra.mxu2 %v4475_v59 }
 0x31f   :  { %2932 = vmatpush.msra.mxu3 %v4455_v46  ;;  %v1806_v46 = vsub.f32 %v1802_v38, %v1804_v60  ;;  %v2960_v37 = vadd.f32 %v2374_v58, %v1804_v60 }
 0x320   :  { %2891 = vmatpush.msra.mxu2 %v4476_v28 }
 0x321   :  { %v2962_v26 = vadd.f32 0.0001, %v2960_v37 }
 0x349   :  { %v2147_v51 = vpop.f32.mrf.mxu1 }
 0x351   :  { %v2038_v57 = vpop.f32.mrf.mxu0  ;;  %v2205_v48 = vpop.f32.mrf.mxu2 }
 0x352   :  { %v2148_v43 = vadd.f32 %v2147_v51, %v2038_v57  ;;  %v2151_v56 = vpop.f32.mrf.mxu1  ;;  %v4486_v51 = vld [vmem:[#allocation61_spill] sm:$0xff] }
 0x353   :  { %v2249_v44 = vpop.f32.mrf.mxu3  ;;  %v2963_v19 = vadd.f32 0.0001, %v4486_v51 }
 0x354   :  { %v2206_v18 = vadd.f32 %v2205_v48, %v2148_v43 }
 0x356   :  { %v2250_v22 = vadd.f32 %v2249_v44, %v2206_v18 }
 0x359   :  { %v2046_v14 = vpop.f32.mrf.mxu0  ;;  %v2210_v29 = vpop.f32.mrf.mxu2 }
 0x35a   :  { %v2152_v23 = vadd.f32 %v2151_v56, %v2046_v14  ;;  %v2365_v62 = vpop.f32.mrf.mxu1 }
 0x35b   :  { %v2255_v15 = vpop.f32.mrf.mxu3 }
 0x35c   :  { %v2211_v12 = vadd.f32 %v2210_v29, %v2152_v23 }
 0x35e   :  { %v2256_v34 = vadd.f32 %v2255_v15, %v2211_v12 }
 0x361   :  { %v2324_v2 = vpop.f32.mrf.mxu0  ;;  %v2404_v4 = vpop.f32.mrf.mxu2 }
 0x362   :  { %v2325_v10 = vadd.f32 %v2324_v2, %v2250_v22  ;;  %v2369_v25 = vpop.f32.mrf.mxu1 }
 0x363   :  { %v2443_v21 = vpop.f32.mrf.mxu3 }
 0x364   :  { %v2366_v52 = vadd.f32 %v2365_v62, %v2325_v10  ;;  %v2444_v49 = vadd.f32 %v2443_v21, %v2404_v4 }
 0x366   :  { %v2372_v5 = vmul.f32 0.020408163, %v2366_v52 }
 0x368   :  { %v2376_v11 = vsub.f32 %v2372_v5, %v2374_v58 }
 0x369   :  { %v2328_v54 = vpop.f32.mrf.mxu0  ;;  %v2412_v32 = vpop.f32.mrf.mxu2 }
 0x36a   :  { %v2964_v17 = vadd.f32 %v2376_v11, %v1806_v46  ;;  %v2329_v24 = vadd.f32 %v2328_v54, %v2256_v34  ;;  %v2563_v47 = vpop.f32.mrf.mxu1 }
 0x36b   :  { %v2447_v13 = vpop.f32.mrf.mxu3 }
 0x36c   :  { %v2966_v0 = vadd.f32 0.0009, %v2964_v17  ;;  %v2370_v27 = vadd.f32 %v2369_v25, %v2329_v24  ;;  %v2448_v44 = vadd.f32 %v2447_v13, %v2412_v32 }
 0x36e   :  { %v4105_v41 = vmul.f32 %v2966_v0, %v2962_v26  ;;  %v2373_v63 = vmul.f32 0.020408163, %v2370_v27  ;;  %v2948_v26 = vmul.f32 2.0, %v4098_v3  ;;  %v2944_v27 = vmul.f32 %v4096_v61, %v4098_v3 }
 0x370   :  { %v2377_v31 = vsub.f32 %v2373_v63, %v4485_v42  ;;  %3038 = vrcp.f32 %v4105_v41  ;;  %v2950_v63 = vmul.f32 %v2948_v26, %v4096_v61  ;;  %vm2975_vm2 = vweird.f32 %v4105_v41 }
 0x371   :  { %v2473_v8 = vpop.f32.mrf.mxu2  ;;  %v2536_v9 = vpop.f32.mrf.mxu0 }
 0x372   :  { %v2965_v50 = vadd.f32 %v2377_v31, %v1807_v53  ;;  %v2474_v59 = vadd.f32 %v2473_v8, %v2444_v49  ;;  %v2567_v55 = vpop.f32.mrf.mxu1 }
 0x373   :  { %v2503_v28 = vpop.f32.mrf.mxu3 }
 0x374   :  { %v2967_v1 = vadd.f32 0.0009, %v2965_v50  ;;  %v2504_v57 = vadd.f32 %v2503_v28, %v2474_v59  ;;  %v2981_v59 = vand.u32 2147483648, %v4105_v41 }
 0x376   :  { %v4112_v43 = vmul.f32 %v2967_v1, %v2963_v19  ;;  %v2537_v48 = vadd.f32 %v2536_v9, %v2504_v57  ;;  %v3039_v10 = vpop.eup %3038  ;;  %v2979_v19 = vand.u32 2147483647, %v4105_v41  ;;  %v2952_v1 = vadd.f32 0.0001, %v2950_v63 }
 0x377   :  { %v2971_v38 = vmul.f32 %v3039_v10, %v4105_v41  ;;  %vm2976_vm1 = vweird.f32 %v3039_v10 }
 0x378   :  { %v2564_v35 = vadd.f32 %v2563_v47, %v2537_v48  ;;  %3040 = vrcp.f32 %v4112_v43  ;;  %vm2977_vm3 = vmor %vm2975_vm2, %vm2976_vm1  ;;  %vm2980_vm4 = vcmp.eq.f32.partialorder %v2979_v19, 8.507059e+37  ;;  %vm2990_vm6 = vweird.f32 %v4112_v43 }
 0x379   :  { %v2478_v36 = vpop.f32.mrf.mxu2  ;;  %v2540_v16 = vpop.f32.mrf.mxu0  ;;  %v2972_v5 = vsub.f32 1.0, %v2971_v38 }
 0x37a   :  { %v2602_v18 = vand.u32 4294901760, %v2564_v35  ;;  %v2479_v22 = vadd.f32 %v2478_v36, %v2448_v44  ;;  %v2982_v44 = vor.u32 1.1754944e-38, %v2981_v59 }
 0x37b   :  { %v2509_v56 = vpop.f32.mrf.mxu3  ;;  %v2973_v25 = vmul.f32 %v3039_v10, %v2972_v5 }
 0x37c   :  { %v2603_v40 = vsub.f32 %v2564_v35, %v2602_v18  ;;  %v2510_v53 = vadd.f32 %v2509_v56, %v2479_v22  ;;  %2716 = vmatmul.f32.vlgmr.msrb.gmra.mxu3 %v2602_v18  ;;  %v4487_v22 = vld [vmem:[#allocation26_spill] sm:$0xff] }
 0x37d   :  { %v2974_v50 = vadd.f32 %v3039_v10, %v2973_v25 }
 0x37e   :  { %v2604_v6 = vand.u32 4294901760, %v2603_v40  ;;  %v2541_v14 = vadd.f32 %v2540_v16, %v2510_v53  ;;  %2774 = vmatmul.f32.vlgmr.msrb.gmra.mxu0 %v2603_v40  ;;  %v3041_v46 = vpop.eup %3040  ;;  %v2996_v53 = vand.u32 2147483648, %v4112_v43 }
 0x37f   :  { %v2986_v13 = vmul.f32 %v3041_v46, %v4112_v43  ;;  %v2978_v57 = vsel %vm2977_vm3, %v3039_v10, %v2974_v50  ;;  %vm2991_vm5 = vweird.f32 %v3041_v46 }
 0x380   :  { %v2605_v7 = vsub.f32 %v2603_v40, %v2604_v6  ;;  %v2568_v45 = vadd.f32 %v2567_v55, %v2541_v14  ;;  %2818 = vmatmul.f32.vlgmr.msrb.gmra.mxu1 %v2604_v6  ;;  %v2994_v55 = vand.u32 2147483647, %v4112_v43  ;;  %vm2992_vm7 = vmor %vm2990_vm6, %vm2991_vm5  ;;  %v4488_v14 = vld [vmem:[#allocation20_spill] sm:$0xff] }
 0x381   :  { %v2987_v8 = vsub.f32 1.0, %v2986_v13 }
 0x382   :  { %v2606_v23 = vand.u32 4294901760, %v2605_v7  ;;  %v2610_v29 = vand.u32 4294901760, %v2568_v45  ;;  %v2953_v7 = vadd.f32 0.0001, %v4488_v14  ;;  %vm2995_vm8 = vcmp.eq.f32.partialorder %v2994_v55, 8.507059e+37 }
 0x383   :  { %v2988_v48 = vmul.f32 %v3041_v46, %v2987_v8 }
 0x384   :  { %v2611_v15 = vsub.f32 %v2568_v45, %v2610_v29  ;;  %2607 = vmatmul.f32.vlgmr.msrb.gmra.mxu2 %v2606_v23  ;;  %2720 = vmatmul.f32.gmra.mxu3 %v2610_v29 }
 0x385   :  { %v2989_v40 = vadd.f32 %v3041_v46, %v2988_v48 }
 0x386   :  { %2779 = vmatmul.f32.gmra.mxu0 %v2611_v15  ;;  %v2612_v12 = vand.u32 4294901760, %v2611_v15 }
 0x387   :  { %v2993_v23 = vsel %vm2992_vm7, %v3041_v46, %v2989_v40 }
 0x388   :  { %2824 = vmatmul.f32.gmra.mxu1 %v2612_v12  ;;  %v2613_v33 = vsub.f32 %v2611_v15, %v2612_v12  ;;  %v2997_v15 = vor.u32 1.1754944e-38, %v2996_v53 }
 0x38a   :  { %v2614_v20 = vand.u32 4294901760, %v2613_v33  ;;  %v2998_v33 = vsel %vm2995_vm8, %v2997_v15, %v2993_v23 }
 0x38c   :  { %2615 = vmatmul.f32.gmra.mxu2 %v2614_v20  ;;  %2934 = vmatmul.f32.vlgmr.msra.gmra.mxu3 %v2602_v18 }
 0x394   :  { %2893 = vmatmul.f32.vlgmr.msra.gmra.mxu2 %v2602_v18  ;;  %2938 = vmatmul.f32.gmra.mxu3 %v2610_v29  ;;  %v2983_v18 = vsel %vm2980_vm4, %v2982_v44, %v2978_v57 }
 0x39c   :  { %2897 = vmatmul.f32.gmra.mxu2 %v2610_v29 }
 0x3fb   :  { %v2775_v4 = vpop.f32.mrf.mxu0 }
 0x3fd   :  { %v2819_v52 = vpop.f32.mrf.mxu1 }
 0x3ff   :  { %v2717_v34 = vpop.f32.mrf.mxu3 }
 0x403   :  { %v2780_v17 = vpop.f32.mrf.mxu0 }
 0x405   :  { %v2825_v42 = vpop.f32.mrf.mxu1 }
 0x407   :  { %v2608_v39 = vpop.f32.mrf.mxu2  ;;  %v2721_v62 = vpop.f32.mrf.mxu3 }
 0x408   :  { %v2718_v2 = vadd.f32 %v2717_v34, %v2608_v39 }
 0x40a   :  { %v2776_v30 = vadd.f32 %v2775_v4, %v2718_v2 }
 0x40c   :  { %v2820_v60 = vadd.f32 %v2819_v52, %v2776_v30 }
 0x40f   :  { %v2616_v21 = vpop.f32.mrf.mxu2  ;;  %v2935_v11 = vpop.f32.mrf.mxu3 }
 0x410   :  { %v2722_v58 = vadd.f32 %v2721_v62, %v2616_v21 }
 0x412   :  { %v2781_v24 = vadd.f32 %v2780_v17, %v2722_v58 }
 0x414   :  { %v2826_v49 = vadd.f32 %v2825_v42, %v2781_v24 }
 0x417   :  { %v2894_v37 = vpop.f32.mrf.mxu2  ;;  %v2939_v47 = vpop.f32.mrf.mxu3 }
 0x418   :  { %v2895_v54 = vadd.f32 %v2894_v37, %v2820_v60 }
 0x41a   :  { %v2936_v32 = vadd.f32 %v2935_v11, %v2895_v54 }
 0x41c   :  { %v2942_v0 = vmul.f32 0.020408163, %v2936_v32 }
 0x41e   :  { %v2946_v31 = vsub.f32 %v2942_v0, %v2944_v27 }
 0x41f   :  { %v2898_v9 = vpop.f32.mrf.mxu2 }
 0x420   :  { %v2954_v28 = vmul.f32 2.0, %v2946_v31  ;;  %v2899_v51 = vadd.f32 %v2898_v9, %v2826_v49 }
 0x422   :  { %v2956_v3 = vadd.f32 0.0009, %v2954_v28  ;;  %v2940_v61 = vadd.f32 %v2939_v47, %v2899_v51 }
 0x424   :  { %v2958_v35 = vmul.f32 %v2956_v3, %v2952_v1  ;;  %v2943_v36 = vmul.f32 0.020408163, %v2940_v61 }
 0x426   :  { %v2947_v56 = vsub.f32 %v2943_v36, %v4487_v22  ;;  %v2984_v16 = vmul.f32 %v2983_v18, %v2958_v35 }
 0x428   :  { %v2955_v41 = vmul.f32 2.0, %v2947_v56  ;;  %v3000_v6 = vmax.f32 %v2984_v16, 0.0 }
 0x42a   :  { %v2957_v45 = vadd.f32 0.0009, %v2955_v41  ;;  %v3002_v29 = vmin.f32 %v3000_v6, 1.0 }
 0x42c   :  { %v2959_v12 = vmul.f32 %v2957_v45, %v2953_v7  ;;  %3004 = vst [vmem:[#allocation10] sm:$0xff] %v3002_v29 }
 0x42e   :  { %v2999_v20 = vmul.f32 %v2998_v33, %v2959_v12 }
 0x430   :  { %v3001_v43 = vmax.f32 %v2999_v20, 0.0 }
 0x432   :  { %v3003_v34 = vmin.f32 %v3001_v43, 1.0 }
 0x434   :  { %3005 = vst [vmem:[#allocation10 + $0x8] sm:$0xff] %v3003_v34 }
 0x435   :  { %3018 = dma.vmem_to_hbm [thread:$0]  %s3011_s8, 256, %s3013_s11, [#allocation4], %s3175_s23, %s3175_s23, %s3176_s24  }
 0x436   :  { %3172 = dma.done.wait [#allocation4], 256  }
 0x437   :  { %3173 = vsyncadd [#allocation4], 4294967040 }
 0x438   :  { %3023 = vsyncpa [#allocation3], 1 }
 0x439   :  { %3024 = vsyncpa [#allocation6], 1 }
 0x43a   :  { %3025 = vsyncpa [#allocation9], 1 }
 0x43b   :  { %3026 = vsyncpa [#allocation4], 1 }

</bundles_post_ra>
